<compile_context>
chip_gen: v7x
topology: tpu7x:2x2x1
jax: 0.10.0
libtpu: 0.0.40
codegen_flags: <defaults>
</compile_context>

<pallas_src>
import functools
import math

import jax
import jax.numpy as jnp
from jax.experimental import pallas as pl
from jax.experimental.pallas import tpu as pltpu


# ----------------------------------------------------------------------------
# In-kernel helpers (traced inside the Pallas kernels)
# ----------------------------------------------------------------------------
def _layernorm(x, g, b, eps=1e-5):
    mu = jnp.mean(x, axis=-1, keepdims=True)
    xc = x - mu
    var = jnp.mean(xc * xc, axis=-1, keepdims=True)
    return xc * jax.lax.rsqrt(var + eps) * g + b


def _softmax(s):
    s = s - jnp.max(s, axis=-1, keepdims=True)
    e = jnp.exp(s)
    return e * pl.reciprocal(jnp.sum(e, axis=-1, keepdims=True), approx=True)


def _split_heads(x2d, n_heads, dh):
    # (S, H*dh) f32 -> (H, S, dh) bf16, batch-leading for the MXU einsums below.
    parts = [x2d[:, h * dh:(h + 1) * dh] for h in range(n_heads)]
    return jnp.stack(parts, axis=0).astype(jnp.bfloat16)


def _mha(q, k, v, wo_h, bo, n_heads, mask=None):
    """Multi-head attention on 2-D (seq, d_model) operands.

    q/k/v: f32 (Sq, D) / (Sk, D) / (Sk, D).
    wo_h : bf16 (H, dh, D) output-projection weight, split per head so that
           concat(heads) @ Wo == sum_h head_h @ wo_h[h]  (avoids a lane concat).
    mask : optional bool (Sq, Sk), True = keep (built once by the caller).
    """
    Sq, D = q.shape
    dh = D // n_heads
    scale = 1.0 / math.sqrt(dh)

    qh = _split_heads(q, n_heads, dh)                      # (H, Sq, dh)
    kh = _split_heads(k, n_heads, dh)                      # (H, Sk, dh)
    vh = _split_heads(v, n_heads, dh)                      # (H, Sk, dh)

    s = jnp.einsum('hsd,htd->hst', qh, kh,
                   preferred_element_type=jnp.float32) * scale       # (H, Sq, Sk) f32
    if mask is not None:
        s = jnp.where(mask[None, :, :], s, -1e30)
    p = _softmax(s)
    o = jnp.einsum('hst,htd->hsd', p.astype(jnp.bfloat16), vh,
                   preferred_element_type=jnp.float32)               # (H, Sq, dh) f32

    out = jnp.zeros((Sq, D), jnp.float32)
    for h in range(n_heads):                                          # Wo fold (tiny matmuls)
        out = out + jnp.dot(o[h].astype(jnp.bfloat16), wo_h[h],
                            preferred_element_type=jnp.float32)
    return out + bo


# ----------------------------------------------------------------------------
# Pallas kernels: whole encoder / decoder stacks, grid = (batch, layer)
# ----------------------------------------------------------------------------
def _encoder_stack_kernel(x_ref,
                          wqkv_ref, bqkv_ref, wo_ref, w1_ref, b1_ref, w2_ref, sm_ref,
                          o_ref, acc_ref, *, n_heads):
    l = pl.program_id(1)
    D = acc_ref.shape[1]

    @pl.when(l == 0)
    def _():
        acc_ref[...] = x_ref[0].astype(jnp.float32)

    x = acc_ref[...]                                       # (S, D) f32 residual stream
    sm = sm_ref[0]                                         # (6, D): ln1g,ln1b,ln2g,ln2b,bo,b2
    ln1g, ln1b = sm[0:1], sm[1:2]
    ln2g, ln2b = sm[2:3], sm[3:4]
    bo, b2 = sm[4:5], sm[5:6]

    # --- self attention (fused QKV) ---
    h = _layernorm(x, ln1g, ln1b)
    qkv = jnp.dot(h.astype(jnp.bfloat16), wqkv_ref[0],
                  preferred_element_type=jnp.float32) + bqkv_ref[0]   # (S, 3D)
    q, k, v = qkv[:, :D], qkv[:, D:2 * D], qkv[:, 2 * D:]
    x = x + _mha(q, k, v, wo_ref[0], bo, n_heads, mask=None)

    # --- MLP ---
    h = _layernorm(x, ln2g, ln2b)
    h = jnp.dot(h.astype(jnp.bfloat16), w1_ref[0],
                preferred_element_type=jnp.float32) + b1_ref[0]
    h = jax.nn.gelu(h)
    h = jnp.dot(h.astype(jnp.bfloat16), w2_ref[0],
                preferred_element_type=jnp.float32) + b2
    x = x + h

    acc_ref[...] = x
    @pl.when(l == pl.num_programs(1) - 1)
    def _():
        o_ref[0] = x.astype(o_ref.dtype)


def _decoder_stack_kernel(y_ref, m_ref,
                          wqkv1_ref, bqkv1_ref, wo1_ref, wq2_ref, wkv2_ref, bkv2_ref,
                          wo2_ref, w1_ref, b1_ref, w2_ref, sm_ref, wout_ref, bout_ref,
                          o_ref, acc_ref, *, n_heads):
    l = pl.program_id(1)
    T, D = acc_ref.shape

    @pl.when(l == 0)
    def _():
        acc_ref[...] = y_ref[0].astype(jnp.float32)

    y = acc_ref[...]                                       # (T, D) f32 residual stream
    m = m_ref[0].astype(jnp.float32)                       # (S, D) encoder memory
    sm = sm_ref[0]                                         # (10, D)
    ln1g, ln1b = sm[0:1], sm[1:2]
    ln2g, ln2b = sm[2:3], sm[3:4]
    ln3g, ln3b = sm[4:5], sm[5:6]
    bo1, bq2, bo2, b2 = sm[6:7], sm[7:8], sm[8:9], sm[9:10]

    # causal mask — built once per layer step (not per head)
    row = jax.lax.broadcasted_iota(jnp.int32, (T, T), 0)
    col = jax.lax.broadcasted_iota(jnp.int32, (T, T), 1)
    causal = col <= row

    # --- causal self attention (fused QKV) ---
    h = _layernorm(y, ln1g, ln1b)
    qkv = jnp.dot(h.astype(jnp.bfloat16), wqkv1_ref[0],
                  preferred_element_type=jnp.float32) + bqkv1_ref[0]
    q, k, v = qkv[:, :D], qkv[:, D:2 * D], qkv[:, 2 * D:]
    y = y + _mha(q, k, v, wo1_ref[0], bo1, n_heads, mask=causal)

    # --- cross attention (queries from decoder, fused K/V from encoder memory) ---
    h = _layernorm(y, ln2g, ln2b)
    q = jnp.dot(h.astype(jnp.bfloat16), wq2_ref[0],
                preferred_element_type=jnp.float32) + bq2
    kv = jnp.dot(m.astype(jnp.bfloat16), wkv2_ref[0],
                 preferred_element_type=jnp.float32) + bkv2_ref[0]
    k, v = kv[:, :D], kv[:, D:]
    y = y + _mha(q, k, v, wo2_ref[0], bo2, n_heads, mask=None)

    # --- MLP ---
    h = _layernorm(y, ln3g, ln3b)
    h = jnp.dot(h.astype(jnp.bfloat16), w1_ref[0],
                preferred_element_type=jnp.float32) + b1_ref[0]
    h = jax.nn.gelu(h)
    h = jnp.dot(h.astype(jnp.bfloat16), w2_ref[0],
                preferred_element_type=jnp.float32) + b2
    y = y + h

    acc_ref[...] = y
    # fused final output projection (lane-dense padded out_dim), written on the last layer only
    @pl.when(l == pl.num_programs(1) - 1)
    def _():
        o_ref[0] = (jnp.dot(y.astype(jnp.bfloat16), wout_ref[...],
                            preferred_element_type=jnp.float32)
                    + bout_ref[...]).astype(o_ref.dtype)


# ----------------------------------------------------------------------------
# pallas_call wrappers
# ----------------------------------------------------------------------------
def _batch_spec(arr):
    z = (0,) * (arr.ndim - 1)
    return pl.BlockSpec((1,) + arr.shape[1:], lambda b, l, z=z: (b,) + z)


def _layer_spec(arr):
    z = (0,) * (arr.ndim - 1)
    return pl.BlockSpec((1,) + arr.shape[1:], lambda b, l, z=z: (l,) + z)


def _const_spec(arr):
    z = (0,) * arr.ndim
    return pl.BlockSpec(arr.shape, lambda b, l, z=z: z)


ENC_KEYS = ["wqkv", "bqkv", "wo", "w1", "b1", "w2", "small"]
DEC_KEYS = ["wqkv1", "bqkv1", "wo1", "wq2", "wkv2", "bkv2", "wo2", "w1", "b1", "w2", "small"]


def encoder_stack(x, enc, n_heads):
    B, S, D = x.shape
    L = enc["wqkv"].shape[0]
    weights = [enc[k] for k in ENC_KEYS]
    return pl.pallas_call(
        functools.partial(_encoder_stack_kernel, n_heads=n_heads),
        out_shape=jax.ShapeDtypeStruct((B, S, D), x.dtype),
        grid=(B, L),
        in_specs=[_batch_spec(x)] + [_layer_spec(w) for w in weights],
        out_specs=pl.BlockSpec((1, S, D), lambda b, l: (b, 0, 0)),
        scratch_shapes=[pltpu.VMEM((S, D), jnp.float32)],
        compiler_params=pltpu.CompilerParams(
            dimension_semantics=("parallel", "arbitrary")),
    )(x, *weights)


def decoder_stack_project(y, mem, dec, w_out, b_out, n_heads):
    B, T, D = y.shape
    OP = w_out.shape[1]
    L = dec["wqkv1"].shape[0]
    weights = [dec[k] for k in DEC_KEYS]
    return pl.pallas_call(
        functools.partial(_decoder_stack_kernel, n_heads=n_heads),
        out_shape=jax.ShapeDtypeStruct((B, T, OP), jnp.float32),
        grid=(B, L),
        in_specs=[_batch_spec(y), _batch_spec(mem)]
                 + [_layer_spec(w) for w in weights]
                 + [_const_spec(w_out), _const_spec(b_out)],
        out_specs=pl.BlockSpec((1, T, OP), lambda b, l: (b, 0, 0)),
        scratch_shapes=[pltpu.VMEM((T, D), jnp.float32)],
        compiler_params=pltpu.CompilerParams(
            dimension_semantics=("parallel", "arbitrary")),
    )(y, mem, *weights, w_out, b_out)


# ----------------------------------------------------------------------------
# Parameters (deterministic, synthetic) and plain-JAX glue
# ----------------------------------------------------------------------------
def _round_up(v, m):
    return ((v + m - 1) // m) * m


def sinusoidal_pe(max_len, d_model):
    pos = jnp.arange(max_len, dtype=jnp.float32)[:, None]
    div = jnp.exp(jnp.arange(0, d_model, 2, dtype=jnp.float32)
                  * (-math.log(10000.0) / d_model))
    pe = jnp.zeros((max_len, d_model), jnp.float32)
    pe = pe.at[:, 0::2].set(jnp.sin(pos * div))
    pe = pe.at[:, 1::2].set(jnp.cos(pos * div))
    return pe


def init_params(key, cfg):
    d, f, H = cfg["d_model"], cfg["d_ff"], cfg["n_heads"]
    le, ld = cfg["n_layers_enc"], cfg["n_layers_dec"]
    dh = d // H
    op = _round_up(cfg["out_dim"], 128)                    # lane-dense padded output dim
    keys = iter(jax.random.split(key, 64))

    def nrm(shape, scale=0.02):
        return (scale * jax.random.normal(next(keys), shape)).astype(jnp.float32)

    def wbf(shape):
        return nrm(shape).astype(jnp.bfloat16)

    enc = dict(
        wqkv=wbf((le, d, 3 * d)),
        bqkv=jnp.zeros((le, 1, 3 * d), jnp.float32),
        wo=wbf((le, H, dh, d)),                            # per-head output projection
        w1=wbf((le, d, f)),
        b1=jnp.zeros((le, 1, f), jnp.float32),
        w2=wbf((le, f, d)),
        # rows: [ln1_g, ln1_b, ln2_g, ln2_b, attn_out_bias, mlp_out_bias]
        small=jnp.tile(jnp.array([1., 0., 1., 0., 0., 0.], jnp.float32)[None, :, None],
                       (le, 1, d)),
    )
    dec = dict(
        wqkv1=wbf((ld, d, 3 * d)),
        bqkv1=jnp.zeros((ld, 1, 3 * d), jnp.float32),
        wo1=wbf((ld, H, dh, d)),
        wq2=wbf((ld, d, d)),
        wkv2=wbf((ld, d, 2 * d)),
        bkv2=jnp.zeros((ld, 1, 2 * d), jnp.float32),
        wo2=wbf((ld, H, dh, d)),
        w1=wbf((ld, d, f)),
        b1=jnp.zeros((ld, 1, f), jnp.float32),
        w2=wbf((ld, f, d)),
        # rows: [ln1g, ln1b, ln2g, ln2b, ln3g, ln3b, bo1, bq2, bo2, b2]
        small=jnp.tile(jnp.array([1., 0., 1., 0., 1., 0., 0., 0., 0., 0.],
                                 jnp.float32)[None, :, None], (ld, 1, d)),
    )
    w_out = jnp.zeros((d, op), jnp.bfloat16).at[:, :cfg["out_dim"]].set(
        nrm((d, cfg["out_dim"])).astype(jnp.bfloat16))
    b_out = jnp.zeros((1, op), jnp.float32)

    # Note: the reference module's `tie_weights` assigns `.weights` (not `.weight`), i.e. a no-op;
    # target embedder and final projection stay independent here as well.
    return dict(
        src_emb=nrm((cfg["in_vocab"], d)),
        tgt_emb=nrm((cfg["out_vocab"], d)),
        pe_src=sinusoidal_pe(cfg["in_block_size"], d),
        pe_tgt=sinusoidal_pe(cfg["out_block_size"], d),
        enc=enc, dec=dec, w_out=w_out, b_out=b_out,
    )


def cross_entropy(logits, targets, ignore_idx):
    logits = logits.reshape(-1, logits.shape[-1]).astype(jnp.float32)
    targets = targets.reshape(-1)
    lse = jax.nn.logsumexp(logits, axis=-1)
    tgt = jnp.take_along_axis(logits, jnp.clip(targets, 0)[:, None], axis=-1)[:, 0]
    nll = lse - tgt
    mask = (targets != ignore_idx).astype(jnp.float32)
    return jnp.sum(nll * mask) / jnp.maximum(jnp.sum(mask), 1.0)


def seq2seq_forward(params, cfg, x_tokens, y_tokens, targets=None):
    n_heads = cfg["n_heads"]
    # embeddings + sinusoidal positional encodings (dropout = 0.0)
    x = params["src_emb"][x_tokens] + params["pe_src"][None, : x_tokens.shape[1], :]
    y = params["tgt_emb"][y_tokens] + params["pe_tgt"][None, : y_tokens.shape[1], :]
    # encoder stack: one pallas_call, activations resident across layers
    x = encoder_stack(x, params["enc"], n_heads)
    # decoder stack + fused final projection: one pallas_call
    logits_pad = decoder_stack_project(y, x, params["dec"],
                                       params["w_out"], params["b_out"], n_heads)
    logits_full = logits_pad[:, :, :cfg["out_dim"]]        # drop lane padding
    if targets is not None:
        loss = cross_entropy(logits_full, targets, cfg["loss_ignore_idx"])
        return logits_full, loss
    # inference path: only last-position logits (matches y[:, [-1], :] in the reference)
    return logits_full[:, -1:, :], None


# ----------------------------------------------------------------------------
if __name__ == "__main__":
    cfg = dict(
        d_model=32, d_ff=128, n_heads=4,
        n_layers_enc=2, n_layers_dec=2,
        in_vocab=11, out_vocab=13, out_dim=13,
        in_block_size=16, out_block_size=8,
        loss_ignore_idx=-1,
    )
    key = jax.random.PRNGKey(0)
    kp, kx, ky, kt = jax.random.split(key, 4)
    params = init_params(kp, cfg)

    B, S, T = 2, 16, 8
    x_tokens = jax.random.randint(kx, (B, S), 0, cfg["in_vocab"], dtype=jnp.int32)
    y_tokens = jax.random.randint(ky, (B, T), 0, cfg["out_vocab"], dtype=jnp.int32)
    targets = jax.random.randint(kt, (B, T), 0, cfg["out_vocab"], dtype=jnp.int32)

    # inference path
    logits, loss = seq2seq_forward(params, cfg, x_tokens, y_tokens, targets=None)
    logits = jax.block_until_ready(logits)
    assert logits.shape == (B, 1, cfg["out_dim"]) and loss is None
    assert bool(jnp.all(jnp.isfinite(logits)))

    # training path (full logits + masked cross entropy)
    logits_tr, loss_tr = seq2seq_forward(params, cfg, x_tokens, y_tokens, targets=targets)
    loss_tr = jax.block_until_ready(loss_tr)
    assert logits_tr.shape == (B, T, cfg["out_dim"])
    assert bool(jnp.isfinite(loss_tr))

    print("KERNEL_OK")
</pallas_src>

<mosaic_0001>
module attributes {stable_mosaic.version = 11 : i64} {
  func.func @_encoder_stack_kernel(%arg0: i32, %arg1: i32, %arg2: memref<1x16x32xf32, #tpu.memory_space<vmem>>, %arg3: memref<1x32x96xbf16, #tpu.memory_space<vmem>>, %arg4: memref<1x1x96xf32, #tpu.memory_space<vmem>>, %arg5: memref<1x4x8x32xbf16, #tpu.memory_space<vmem>>, %arg6: memref<1x32x128xbf16, #tpu.memory_space<vmem>>, %arg7: memref<1x1x128xf32, #tpu.memory_space<vmem>>, %arg8: memref<1x128x32xbf16, #tpu.memory_space<vmem>>, %arg9: memref<1x6x32xf32, #tpu.memory_space<vmem>>, %arg10: memref<1x16x32xf32, #tpu.memory_space<vmem>>, %arg11: memref<16x32xf32, #tpu.memory_space<vmem>>) attributes {dimension_semantics = [#tpu.dimension_semantics<parallel>, #tpu.dimension_semantics<arbitrary>], iteration_bounds = array<i64: 2, 2>, scalar_prefetch = 0 : i64, scratch_operands = 1 : i64, tpu.core_type = #tpu.core_type<tc>, window_params = [{transform_indices = @transform_0, window_bounds = array<i64: 1, 16, 32>}, {transform_indices = @transform_1, window_bounds = array<i64: 1, 32, 96>}, {transform_indices = @transform_2, window_bounds = array<i64: 1, 1, 96>}, {transform_indices = @transform_3, window_bounds = array<i64: 1, 4, 8, 32>}, {transform_indices = @transform_4, window_bounds = array<i64: 1, 32, 128>}, {transform_indices = @transform_5, window_bounds = array<i64: 1, 1, 128>}, {transform_indices = @transform_6, window_bounds = array<i64: 1, 128, 32>}, {transform_indices = @transform_7, window_bounds = array<i64: 1, 6, 32>}, {transform_indices = @transform_8, window_bounds = array<i64: 1, 16, 32>}]} {
    %c0_i32 = arith.constant 0 : i32
    %0 = arith.cmpi eq, %arg1, %c0_i32 : i32
    %1 = arith.extui %0 : i1 to i32
    %c0_i32_0 = arith.constant 0 : i32
    %2 = arith.cmpi ne, %1, %c0_i32_0 : i32
    scf.if %2 {
      %c0_53 = arith.constant 0 : index
      %c0_54 = arith.constant 0 : index
      %c0_55 = arith.constant 0 : index
      %174 = vector.load %arg2[%c0_53, %c0_54, %c0_55] : memref<1x16x32xf32, #tpu.memory_space<vmem>>, vector<1x16x32xf32>
      %175 = vector.shape_cast %174 : vector<1x16x32xf32> to vector<16x32xf32>
      %c0_56 = arith.constant 0 : index
      %c0_57 = arith.constant 0 : index
      %176 = vector.load %arg11[%c0_56, %c0_57] : memref<16x32xf32, #tpu.memory_space<vmem>>, vector<16x32xf32>
      tpu.vector_store %arg11[%c0_56, %c0_57], %175 {strides = array<i32>} : memref<16x32xf32, #tpu.memory_space<vmem>>, vector<16x32xf32>,
    } else {
    }
    %c0 = arith.constant 0 : index
    %c0_1 = arith.constant 0 : index
    %3 = vector.load %arg11[%c0, %c0_1] : memref<16x32xf32, #tpu.memory_space<vmem>>, vector<16x32xf32>
    %c0_2 = arith.constant 0 : index
    %c0_3 = arith.constant 0 : index
    %c0_4 = arith.constant 0 : index
    %4 = vector.load %arg9[%c0_2, %c0_3, %c0_4] : memref<1x6x32xf32, #tpu.memory_space<vmem>>, vector<1x6x32xf32>
    %5 = vector.shape_cast %4 : vector<1x6x32xf32> to vector<6x32xf32>
    %6 = vector.extract_strided_slice %5 {offsets = [0, 0], sizes = [1, 32], strides = [1, 1]} : vector<6x32xf32> to vector<1x32xf32>
    %7 = vector.extract_strided_slice %5 {offsets = [1, 0], sizes = [1, 32], strides = [1, 1]} : vector<6x32xf32> to vector<1x32xf32>
    %8 = vector.extract_strided_slice %5 {offsets = [2, 0], sizes = [1, 32], strides = [1, 1]} : vector<6x32xf32> to vector<1x32xf32>
    %9 = vector.extract_strided_slice %5 {offsets = [3, 0], sizes = [1, 32], strides = [1, 1]} : vector<6x32xf32> to vector<1x32xf32>
    %10 = vector.extract_strided_slice %5 {offsets = [4, 0], sizes = [1, 32], strides = [1, 1]} : vector<6x32xf32> to vector<1x32xf32>
    %11 = vector.extract_strided_slice %5 {offsets = [5, 0], sizes = [1, 32], strides = [1, 1]} : vector<6x32xf32> to vector<1x32xf32>
    %cst = arith.constant dense<0.000000e+00> : vector<16xf32>
    %12 = vector.multi_reduction <add>, %3, %cst [1] : vector<16x32xf32> to vector<16xf32>
    %13 = vector.shape_cast %12 : vector<16xf32> to vector<16x1xf32>
    %cst_5 = arith.constant 3.200000e+01 : f32
    %14 = vector.broadcast %cst_5 : f32 to vector<16x1xf32>
    %15 = arith.divf %13, %14 : vector<16x1xf32>
    %16 = vector.broadcast %15 : vector<16x1xf32> to vector<16x32xf32>
    %17 = arith.subf %3, %16 : vector<16x32xf32>
    %18 = arith.mulf %17, %17 : vector<16x32xf32>
    %cst_6 = arith.constant dense<0.000000e+00> : vector<16xf32>
    %19 = vector.multi_reduction <add>, %18, %cst_6 [1] : vector<16x32xf32> to vector<16xf32>
    %20 = vector.shape_cast %19 : vector<16xf32> to vector<16x1xf32>
    %cst_7 = arith.constant 3.200000e+01 : f32
    %21 = vector.broadcast %cst_7 : f32 to vector<16x1xf32>
    %22 = arith.divf %20, %21 : vector<16x1xf32>
    %cst_8 = arith.constant 9.99999974E-6 : f32
    %23 = vector.broadcast %cst_8 : f32 to vector<16x1xf32>
    %24 = arith.addf %22, %23 : vector<16x1xf32>
    %25 = math.rsqrt %24 : vector<16x1xf32>
    %26 = vector.broadcast %25 : vector<16x1xf32> to vector<16x32xf32>
    %27 = arith.mulf %17, %26 : vector<16x32xf32>
    %28 = vector.broadcast %6 : vector<1x32xf32> to vector<16x32xf32>
    %29 = arith.mulf %27, %28 : vector<16x32xf32>
    %30 = vector.broadcast %7 : vector<1x32xf32> to vector<16x32xf32>
    %31 = arith.addf %29, %30 : vector<16x32xf32>
    %32 = arith.truncf %31 : vector<16x32xf32> to vector<16x32xbf16>
    %c0_9 = arith.constant 0 : index
    %c0_10 = arith.constant 0 : index
    %c0_11 = arith.constant 0 : index
    %33 = vector.load %arg3[%c0_9, %c0_10, %c0_11] : memref<1x32x96xbf16, #tpu.memory_space<vmem>>, vector<1x32x96xbf16>
    %34 = vector.shape_cast %33 : vector<1x32x96xbf16> to vector<32x96xbf16>
    %cst_12 = arith.constant dense<0.000000e+00> : vector<16x96xf32>
    %35 = tpu.matmul %32, %34, %cst_12 {dimension_numbers = #tpu.dot_dimension_numbers<[1], [0], [0], [1], [0, 0, 1, 1], [], []>} : vector<16x32xbf16>, vector<32x96xbf16>, vector<16x96xf32> -> vector<16x96xf32>
    %c0_13 = arith.constant 0 : index
    %c0_14 = arith.constant 0 : index
    %c0_15 = arith.constant 0 : index
    %36 = vector.load %arg4[%c0_13, %c0_14, %c0_15] : memref<1x1x96xf32, #tpu.memory_space<vmem>>, vector<1x1x96xf32>
    %37 = vector.shape_cast %36 : vector<1x1x96xf32> to vector<1x96xf32>
    %38 = vector.broadcast %37 : vector<1x96xf32> to vector<16x96xf32>
    %39 = arith.addf %35, %38 : vector<16x96xf32>
    %40 = vector.extract_strided_slice %39 {offsets = [0, 0], sizes = [16, 32], strides = [1, 1]} : vector<16x96xf32> to vector<16x32xf32>
    %41 = vector.extract_strided_slice %39 {offsets = [0, 32], sizes = [16, 32], strides = [1, 1]} : vector<16x96xf32> to vector<16x32xf32>
    %42 = vector.extract_strided_slice %39 {offsets = [0, 64], sizes = [16, 32], strides = [1, 1]} : vector<16x96xf32> to vector<16x32xf32>
    %c0_16 = arith.constant 0 : index
    %c0_17 = arith.constant 0 : index
    %c0_18 = arith.constant 0 : index
    %c0_19 = arith.constant 0 : index
    %43 = vector.load %arg5[%c0_16, %c0_17, %c0_18, %c0_19] : memref<1x4x8x32xbf16, #tpu.memory_space<vmem>>, vector<1x4x8x32xbf16>
    %44 = vector.shape_cast %43 : vector<1x4x8x32xbf16> to vector<4x8x32xbf16>
    %45 = vector.extract_strided_slice %40 {offsets = [0, 0], sizes = [16, 8], strides = [1, 1]} : vector<16x32xf32> to vector<16x8xf32>
    %46 = vector.extract_strided_slice %40 {offsets = [0, 8], sizes = [16, 8], strides = [1, 1]} : vector<16x32xf32> to vector<16x8xf32>
    %47 = vector.extract_strided_slice %40 {offsets = [0, 16], sizes = [16, 8], strides = [1, 1]} : vector<16x32xf32> to vector<16x8xf32>
    %48 = vector.extract_strided_slice %40 {offsets = [0, 24], sizes = [16, 8], strides = [1, 1]} : vector<16x32xf32> to vector<16x8xf32>
    %49 = vector.shape_cast %45 : vector<16x8xf32> to vector<1x16x8xf32>
    %50 = vector.shape_cast %46 : vector<16x8xf32> to vector<1x16x8xf32>
    %51 = vector.shape_cast %47 : vector<16x8xf32> to vector<1x16x8xf32>
    %52 = vector.shape_cast %48 : vector<16x8xf32> to vector<1x16x8xf32>
    %53 = tpu.concatenate %49, %50, %51, %52 in 0 : vector<1x16x8xf32>, vector<1x16x8xf32>, vector<1x16x8xf32>, vector<1x16x8xf32> -> vector<4x16x8xf32>
    %54 = arith.truncf %53 : vector<4x16x8xf32> to vector<4x16x8xbf16>
    %55 = vector.extract_strided_slice %41 {offsets = [0, 0], sizes = [16, 8], strides = [1, 1]} : vector<16x32xf32> to vector<16x8xf32>
    %56 = vector.extract_strided_slice %41 {offsets = [0, 8], sizes = [16, 8], strides = [1, 1]} : vector<16x32xf32> to vector<16x8xf32>
    %57 = vector.extract_strided_slice %41 {offsets = [0, 16], sizes = [16, 8], strides = [1, 1]} : vector<16x32xf32> to vector<16x8xf32>
    %58 = vector.extract_strided_slice %41 {offsets = [0, 24], sizes = [16, 8], strides = [1, 1]} : vector<16x32xf32> to vector<16x8xf32>
    %59 = vector.shape_cast %55 : vector<16x8xf32> to vector<1x16x8xf32>
    %60 = vector.shape_cast %56 : vector<16x8xf32> to vector<1x16x8xf32>
    %61 = vector.shape_cast %57 : vector<16x8xf32> to vector<1x16x8xf32>
    %62 = vector.shape_cast %58 : vector<16x8xf32> to vector<1x16x8xf32>
    %63 = tpu.concatenate %59, %60, %61, %62 in 0 : vector<1x16x8xf32>, vector<1x16x8xf32>, vector<1x16x8xf32>, vector<1x16x8xf32> -> vector<4x16x8xf32>
    %64 = arith.truncf %63 : vector<4x16x8xf32> to vector<4x16x8xbf16>
    %65 = vector.extract_strided_slice %42 {offsets = [0, 0], sizes = [16, 8], strides = [1, 1]} : vector<16x32xf32> to vector<16x8xf32>
    %66 = vector.extract_strided_slice %42 {offsets = [0, 8], sizes = [16, 8], strides = [1, 1]} : vector<16x32xf32> to vector<16x8xf32>
    %67 = vector.extract_strided_slice %42 {offsets = [0, 16], sizes = [16, 8], strides = [1, 1]} : vector<16x32xf32> to vector<16x8xf32>
    %68 = vector.extract_strided_slice %42 {offsets = [0, 24], sizes = [16, 8], strides = [1, 1]} : vector<16x32xf32> to vector<16x8xf32>
    %69 = vector.shape_cast %65 : vector<16x8xf32> to vector<1x16x8xf32>
    %70 = vector.shape_cast %66 : vector<16x8xf32> to vector<1x16x8xf32>
    %71 = vector.shape_cast %67 : vector<16x8xf32> to vector<1x16x8xf32>
    %72 = vector.shape_cast %68 : vector<16x8xf32> to vector<1x16x8xf32>
    %73 = tpu.concatenate %69, %70, %71, %72 in 0 : vector<1x16x8xf32>, vector<1x16x8xf32>, vector<1x16x8xf32>, vector<1x16x8xf32> -> vector<4x16x8xf32>
    %74 = arith.truncf %73 : vector<4x16x8xf32> to vector<4x16x8xbf16>
    "tpu.trace_start"() <{level = 10 : i32, message = "hsd,htd->hst"}> : () -> ()
    %cst_20 = arith.constant dense<0.000000e+00> : vector<4x16x16xf32>
    %75 = tpu.matmul %54, %64, %cst_20 {dimension_numbers = #tpu.dot_dimension_numbers<[2], [2], [1], [1], [0, 0, 0, 1, 1, 1], [0], [0]>} : vector<4x16x8xbf16>, vector<4x16x8xbf16>, vector<4x16x16xf32> -> vector<4x16x16xf32>
    "tpu.trace_stop"() : () -> ()
    %cst_21 = arith.constant 0.353553385 : f32
    %76 = vector.broadcast %cst_21 : f32 to vector<4x16x16xf32>
    %77 = arith.mulf %75, %76 : vector<4x16x16xf32>
    %cst_22 = arith.constant dense<0xFF800000> : vector<4x16xf32>
    %78 = vector.multi_reduction <maximumf>, %77, %cst_22 [2] : vector<4x16x16xf32> to vector<4x16xf32>
    %79 = vector.shape_cast %78 : vector<4x16xf32> to vector<4x16x1xf32>
    %80 = vector.broadcast %79 : vector<4x16x1xf32> to vector<4x16x16xf32>
    %81 = arith.subf %77, %80 : vector<4x16x16xf32>
    %82 = math.exp %81 : vector<4x16x16xf32>
    %cst_23 = arith.constant dense<0.000000e+00> : vector<4x16xf32>
    %83 = vector.multi_reduction <add>, %82, %cst_23 [2] : vector<4x16x16xf32> to vector<4x16xf32>
    %84 = vector.shape_cast %83 : vector<4x16xf32> to vector<4x16x1xf32>
    %85 = tpu.reciprocal %84 {approx = true} : vector<4x16x1xf32> -> vector<4x16x1xf32>
    %86 = vector.broadcast %85 : vector<4x16x1xf32> to vector<4x16x16xf32>
    %87 = arith.mulf %82, %86 : vector<4x16x16xf32>
    %88 = arith.truncf %87 : vector<4x16x16xf32> to vector<4x16x16xbf16>
    "tpu.trace_start"() <{level = 10 : i32, message = "hst,htd->hsd"}> : () -> ()
    %cst_24 = arith.constant dense<0.000000e+00> : vector<4x16x8xf32>
    %89 = tpu.matmul %88, %74, %cst_24 {dimension_numbers = #tpu.dot_dimension_numbers<[2], [1], [1], [2], [0, 0, 0, 1, 1, 2], [0], [0]>} : vector<4x16x16xbf16>, vector<4x16x8xbf16>, vector<4x16x8xf32> -> vector<4x16x8xf32>
    %cst_25 = arith.constant 0.000000e+00 : f32
    "tpu.trace_stop"() : () -> ()
    %90 = vector.broadcast %cst_25 : f32 to vector<16x32xf32>
    %91 = vector.extract_strided_slice %89 {offsets = [0, 0, 0], sizes = [1, 16, 8], strides = [1, 1, 1]} : vector<4x16x8xf32> to vector<1x16x8xf32>
    %92 = vector.shape_cast %91 : vector<1x16x8xf32> to vector<16x8xf32>
    %93 = arith.truncf %92 : vector<16x8xf32> to vector<16x8xbf16>
    %94 = vector.extract_strided_slice %44 {offsets = [0, 0, 0], sizes = [1, 8, 32], strides = [1, 1, 1]} : vector<4x8x32xbf16> to vector<1x8x32xbf16>
    %95 = vector.shape_cast %94 : vector<1x8x32xbf16> to vector<8x32xbf16>
    %cst_26 = arith.constant dense<0.000000e+00> : vector<16x32xf32>
    %96 = tpu.matmul %93, %95, %cst_26 {dimension_numbers = #tpu.dot_dimension_numbers<[1], [0], [0], [1], [0, 0, 1, 1], [], []>} : vector<16x8xbf16>, vector<8x32xbf16>, vector<16x32xf32> -> vector<16x32xf32>
    %97 = arith.addf %90, %96 : vector<16x32xf32>
    %98 = vector.extract_strided_slice %89 {offsets = [1, 0, 0], sizes = [1, 16, 8], strides = [1, 1, 1]} : vector<4x16x8xf32> to vector<1x16x8xf32>
    %99 = vector.shape_cast %98 : vector<1x16x8xf32> to vector<16x8xf32>
    %100 = arith.truncf %99 : vector<16x8xf32> to vector<16x8xbf16>
    %101 = vector.extract_strided_slice %44 {offsets = [1, 0, 0], sizes = [1, 8, 32], strides = [1, 1, 1]} : vector<4x8x32xbf16> to vector<1x8x32xbf16>
    %102 = vector.shape_cast %101 : vector<1x8x32xbf16> to vector<8x32xbf16>
    %cst_27 = arith.constant dense<0.000000e+00> : vector<16x32xf32>
    %103 = tpu.matmul %100, %102, %cst_27 {dimension_numbers = #tpu.dot_dimension_numbers<[1], [0], [0], [1], [0, 0, 1, 1], [], []>} : vector<16x8xbf16>, vector<8x32xbf16>, vector<16x32xf32> -> vector<16x32xf32>
    %104 = arith.addf %97, %103 : vector<16x32xf32>
    %105 = vector.extract_strided_slice %89 {offsets = [2, 0, 0], sizes = [1, 16, 8], strides = [1, 1, 1]} : vector<4x16x8xf32> to vector<1x16x8xf32>
    %106 = vector.shape_cast %105 : vector<1x16x8xf32> to vector<16x8xf32>
    %107 = arith.truncf %106 : vector<16x8xf32> to vector<16x8xbf16>
    %108 = vector.extract_strided_slice %44 {offsets = [2, 0, 0], sizes = [1, 8, 32], strides = [1, 1, 1]} : vector<4x8x32xbf16> to vector<1x8x32xbf16>
    %109 = vector.shape_cast %108 : vector<1x8x32xbf16> to vector<8x32xbf16>
    %cst_28 = arith.constant dense<0.000000e+00> : vector<16x32xf32>
    %110 = tpu.matmul %107, %109, %cst_28 {dimension_numbers = #tpu.dot_dimension_numbers<[1], [0], [0], [1], [0, 0, 1, 1], [], []>} : vector<16x8xbf16>, vector<8x32xbf16>, vector<16x32xf32> -> vector<16x32xf32>
    %111 = arith.addf %104, %110 : vector<16x32xf32>
    %112 = vector.extract_strided_slice %89 {offsets = [3, 0, 0], sizes = [1, 16, 8], strides = [1, 1, 1]} : vector<4x16x8xf32> to vector<1x16x8xf32>
    %113 = vector.shape_cast %112 : vector<1x16x8xf32> to vector<16x8xf32>
    %114 = arith.truncf %113 : vector<16x8xf32> to vector<16x8xbf16>
    %115 = vector.extract_strided_slice %44 {offsets = [3, 0, 0], sizes = [1, 8, 32], strides = [1, 1, 1]} : vector<4x8x32xbf16> to vector<1x8x32xbf16>
    %116 = vector.shape_cast %115 : vector<1x8x32xbf16> to vector<8x32xbf16>
    %cst_29 = arith.constant dense<0.000000e+00> : vector<16x32xf32>
    %117 = tpu.matmul %114, %116, %cst_29 {dimension_numbers = #tpu.dot_dimension_numbers<[1], [0], [0], [1], [0, 0, 1, 1], [], []>} : vector<16x8xbf16>, vector<8x32xbf16>, vector<16x32xf32> -> vector<16x32xf32>
    %118 = arith.addf %111, %117 : vector<16x32xf32>
    %119 = vector.broadcast %10 : vector<1x32xf32> to vector<16x32xf32>
    %120 = arith.addf %118, %119 : vector<16x32xf32>
    %121 = arith.addf %3, %120 : vector<16x32xf32>
    %cst_30 = arith.constant dense<0.000000e+00> : vector<16xf32>
    %122 = vector.multi_reduction <add>, %121, %cst_30 [1] : vector<16x32xf32> to vector<16xf32>
    %123 = vector.shape_cast %122 : vector<16xf32> to vector<16x1xf32>
    %cst_31 = arith.constant 3.200000e+01 : f32
    %124 = vector.broadcast %cst_31 : f32 to vector<16x1xf32>
    %125 = arith.divf %123, %124 : vector<16x1xf32>
    %126 = vector.broadcast %125 : vector<16x1xf32> to vector<16x32xf32>
    %127 = arith.subf %121, %126 : vector<16x32xf32>
    %128 = arith.mulf %127, %127 : vector<16x32xf32>
    %cst_32 = arith.constant dense<0.000000e+00> : vector<16xf32>
    %129 = vector.multi_reduction <add>, %128, %cst_32 [1] : vector<16x32xf32> to vector<16xf32>
    %130 = vector.shape_cast %129 : vector<16xf32> to vector<16x1xf32>
    %cst_33 = arith.constant 3.200000e+01 : f32
    %131 = vector.broadcast %cst_33 : f32 to vector<16x1xf32>
    %132 = arith.divf %130, %131 : vector<16x1xf32>
    %cst_34 = arith.constant 9.99999974E-6 : f32
    %133 = vector.broadcast %cst_34 : f32 to vector<16x1xf32>
    %134 = arith.addf %132, %133 : vector<16x1xf32>
    %135 = math.rsqrt %134 : vector<16x1xf32>
    %136 = vector.broadcast %135 : vector<16x1xf32> to vector<16x32xf32>
    %137 = arith.mulf %127, %136 : vector<16x32xf32>
    %138 = vector.broadcast %8 : vector<1x32xf32> to vector<16x32xf32>
    %139 = arith.mulf %137, %138 : vector<16x32xf32>
    %140 = vector.broadcast %9 : vector<1x32xf32> to vector<16x32xf32>
    %141 = arith.addf %139, %140 : vector<16x32xf32>
    %142 = arith.truncf %141 : vector<16x32xf32> to vector<16x32xbf16>
    %c0_35 = arith.constant 0 : index
    %c0_36 = arith.constant 0 : index
    %c0_37 = arith.constant 0 : index
    %143 = vector.load %arg6[%c0_35, %c0_36, %c0_37] : memref<1x32x128xbf16, #tpu.memory_space<vmem>>, vector<1x32x128xbf16>
    %144 = vector.shape_cast %143 : vector<1x32x128xbf16> to vector<32x128xbf16>
    %cst_38 = arith.constant dense<0.000000e+00> : vector<16x128xf32>
    %145 = tpu.matmul %142, %144, %cst_38 {dimension_numbers = #tpu.dot_dimension_numbers<[1], [0], [0], [1], [0, 0, 1, 1], [], []>} : vector<16x32xbf16>, vector<32x128xbf16>, vector<16x128xf32> -> vector<16x128xf32>
    %c0_39 = arith.constant 0 : index
    %c0_40 = arith.constant 0 : index
    %c0_41 = arith.constant 0 : index
    %146 = vector.load %arg7[%c0_39, %c0_40, %c0_41] : memref<1x1x128xf32, #tpu.memory_space<vmem>>, vector<1x1x128xf32>
    %147 = vector.shape_cast %146 : vector<1x1x128xf32> to vector<1x128xf32>
    %148 = vector.broadcast %147 : vector<1x128xf32> to vector<16x128xf32>
    %149 = arith.addf %145, %148 : vector<16x128xf32>
    %150 = arith.mulf %149, %149 : vector<16x128xf32>
    %151 = arith.mulf %149, %150 : vector<16x128xf32>
    %cst_42 = arith.constant 4.471500e-02 : f32
    %152 = vector.broadcast %cst_42 : f32 to vector<16x128xf32>
    %153 = arith.mulf %152, %151 : vector<16x128xf32>
    %154 = arith.addf %149, %153 : vector<16x128xf32>
    %cst_43 = arith.constant 0.797884583 : f32
    %155 = vector.broadcast %cst_43 : f32 to vector<16x128xf32>
    %156 = arith.mulf %155, %154 : vector<16x128xf32>
    %157 = math.tanh %156 : vector<16x128xf32>
    %cst_44 = arith.constant 1.000000e+00 : f32
    %158 = vector.broadcast %cst_44 : f32 to vector<16x128xf32>
    %159 = arith.addf %158, %157 : vector<16x128xf32>
    %cst_45 = arith.constant 5.000000e-01 : f32
    %160 = vector.broadcast %cst_45 : f32 to vector<16x128xf32>
    %161 = arith.mulf %160, %159 : vector<16x128xf32>
    %162 = arith.mulf %149, %161 : vector<16x128xf32>
    %163 = arith.truncf %162 : vector<16x128xf32> to vector<16x128xbf16>
    %c0_46 = arith.constant 0 : index
    %c0_47 = arith.constant 0 : index
    %c0_48 = arith.constant 0 : index
    %164 = vector.load %arg8[%c0_46, %c0_47, %c0_48] : memref<1x128x32xbf16, #tpu.memory_space<vmem>>, vector<1x128x32xbf16>
    %165 = vector.shape_cast %164 : vector<1x128x32xbf16> to vector<128x32xbf16>
    %cst_49 = arith.constant dense<0.000000e+00> : vector<16x32xf32>
    %166 = tpu.matmul %163, %165, %cst_49 {dimension_numbers = #tpu.dot_dimension_numbers<[1], [0], [0], [1], [0, 0, 1, 1], [], []>} : vector<16x128xbf16>, vector<128x32xbf16>, vector<16x32xf32> -> vector<16x32xf32>
    %167 = vector.broadcast %11 : vector<1x32xf32> to vector<16x32xf32>
    %168 = arith.addf %166, %167 : vector<16x32xf32>
    %169 = arith.addf %121, %168 : vector<16x32xf32>
    %c0_50 = arith.constant 0 : index
    %c0_51 = arith.constant 0 : index
    %170 = vector.load %arg11[%c0_50, %c0_51] : memref<16x32xf32, #tpu.memory_space<vmem>>, vector<16x32xf32>
    tpu.vector_store %arg11[%c0_50, %c0_51], %169 {strides = array<i32>} : memref<16x32xf32, #tpu.memory_space<vmem>>, vector<16x32xf32>,
    %c1_i32 = arith.constant 1 : i32
    %171 = arith.cmpi eq, %arg1, %c1_i32 : i32
    %172 = arith.extui %171 : i1 to i32
    %c0_i32_52 = arith.constant 0 : i32
    %173 = arith.cmpi ne, %172, %c0_i32_52 : i32
    scf.if %173 {
      %c0_53 = arith.constant 0 : index
      %c0_54 = arith.constant 0 : index
      %c0_55 = arith.constant 0 : index
      %174 = vector.load %arg10[%c0_53, %c0_54, %c0_55] : memref<1x16x32xf32, #tpu.memory_space<vmem>>, vector<1x16x32xf32>
      %175 = vector.shape_cast %174 : vector<1x16x32xf32> to vector<16x32xf32>
      %176 = vector.shape_cast %169 : vector<16x32xf32> to vector<1x16x32xf32>
      tpu.vector_store %arg10[%c0_53, %c0_54, %c0_55], %176 {strides = array<i32>} : memref<1x16x32xf32, #tpu.memory_space<vmem>>, vector<1x16x32xf32>,
    } else {
    }
    return
  }
  func.func @transform_0(%arg0: i32, %arg1: i32) -> (i32, i32, i32) {
    %c0_i32 = arith.constant 0 : i32
    %c0_i32_0 = arith.constant 0 : i32
    %c0_i32_1 = arith.constant 0 : i32
    return %arg0, %c0_i32, %c0_i32_0 : i32, i32, i32
  }
  func.func @transform_1(%arg0: i32, %arg1: i32) -> (i32, i32, i32) {
    %c0_i32 = arith.constant 0 : i32
    %c0_i32_0 = arith.constant 0 : i32
    %c0_i32_1 = arith.constant 0 : i32
    return %arg1, %c0_i32, %c0_i32_0 : i32, i32, i32
  }
  func.func @transform_2(%arg0: i32, %arg1: i32) -> (i32, i32, i32) {
    %c0_i32 = arith.constant 0 : i32
    %c0_i32_0 = arith.constant 0 : i32
    %c0_i32_1 = arith.constant 0 : i32
    return %arg1, %c0_i32, %c0_i32_0 : i32, i32, i32
  }
  func.func @transform_3(%arg0: i32, %arg1: i32) -> (i32, i32, i32, i32) {
    %c0_i32 = arith.constant 0 : i32
    %c0_i32_0 = arith.constant 0 : i32
    %c0_i32_1 = arith.constant 0 : i32
    %c0_i32_2 = arith.constant 0 : i32
    return %arg1, %c0_i32, %c0_i32_0, %c0_i32_1 : i32, i32, i32, i32
  }
  func.func @transform_4(%arg0: i32, %arg1: i32) -> (i32, i32, i32) {
    %c0_i32 = arith.constant 0 : i32
    %c0_i32_0 = arith.constant 0 : i32
    %c0_i32_1 = arith.constant 0 : i32
    return %arg1, %c0_i32, %c0_i32_0 : i32, i32, i32
  }
  func.func @transform_5(%arg0: i32, %arg1: i32) -> (i32, i32, i32) {
    %c0_i32 = arith.constant 0 : i32
    %c0_i32_0 = arith.constant 0 : i32
    %c0_i32_1 = arith.constant 0 : i32
    return %arg1, %c0_i32, %c0_i32_0 : i32, i32, i32
  }
  func.func @transform_6(%arg0: i32, %arg1: i32) -> (i32, i32, i32) {
    %c0_i32 = arith.constant 0 : i32
    %c0_i32_0 = arith.constant 0 : i32
    %c0_i32_1 = arith.constant 0 : i32
    return %arg1, %c0_i32, %c0_i32_0 : i32, i32, i32
  }
  func.func @transform_7(%arg0: i32, %arg1: i32) -> (i32, i32, i32) {
    %c0_i32 = arith.constant 0 : i32
    %c0_i32_0 = arith.constant 0 : i32
    %c0_i32_1 = arith.constant 0 : i32
    return %arg1, %c0_i32, %c0_i32_0 : i32, i32, i32
  }
  func.func @transform_8(%arg0: i32, %arg1: i32) -> (i32, i32, i32) {
    %c0_i32 = arith.constant 0 : i32
    %c0_i32_0 = arith.constant 0 : i32
    %c0_i32_1 = arith.constant 0 : i32
    return %arg0, %c0_i32, %c0_i32_0 : i32, i32, i32
  }
}

</mosaic_0001>

<bundles_post_ra>
// kernel: tpu_custom_call.1
= control target key start
LH: loop header
LB: loop body
LE: loop exit
PB: predicated region body
PF: predicated region fallthrough
CT: control target
= control target key end

     0   :  { %s2578_s0 = inlined_call_operand.vmem [shape: f32[2,16,32], index: 0, kind: input, shape index: {}]   ;;  %s2579_s1 = inlined_call_operand.vmem [shape: bf16[2,32,96], index: 1, kind: input, shape index: {}]   ;;  %s2580_s2 = inlined_call_operand.vmem [shape: f32[2,1,96], index: 2, kind: input, shape index: {}]   ;;  %s2581_s3 = inlined_call_operand.vmem [shape: bf16[2,4,8,32], index: 3, kind: input, shape index: {}]   ;;  %s2582_s4 = inlined_call_operand.vmem [shape: bf16[2,32,128], index: 4, kind: input, shape index: {}]   ;;  %s2583_s5 = inlined_call_operand.vmem [shape: f32[2,1,128], index: 5, kind: input, shape index: {}]   ;;  %s2584_s6 = inlined_call_operand.vmem [shape: bf16[2,128,32], index: 6, kind: input, shape index: {}]   ;;  %s2585_s7 = inlined_call_operand.vmem [shape: f32[2,6,32], index: 7, kind: input, shape index: {}]   ;;  %s2586_s8 = inlined_call_operand.hbm [shape: f32[2,16,32], index: 8, kind: output, shape index: {}]  }
   0x1   :  { %2596 = sst [smem:[#allocation15_spill]] %s2578_s0 }
   0x2   :  { %2597 = sst [smem:[#allocation16_spill]] %s2579_s1 }
   0x3   :  { %2598 = sst [smem:[#allocation17_spill]] %s2581_s3 }
   0x4   :  { %13 = vsyncpa [#allocation4], 0 }
   0x5   :  { %15 = vsyncpa [#allocation4 + $0x1], 0  ;;  %s2201_s27 = smov 0   ;;  %s2203_s28 = smov 0  }
   0x6   :  { %s2205_s29 = smov 0   ;;  %s2207_s30 = smov 0  }
   0x7   :  { %s2209_s9 = smov 0   ;;  %s2211_s10 = smov 0  }
   0x8   :  { %s2213_s11 = smov 0   ;;  %s2215_s12 = smov 0  }
   0x9 LB: > { %2599 = sst [smem:[#allocation6_spill]] %s2116_s27  ;;  %s1694_s13 = sadd.s32 4294967295, %s2144_s12   ;;  %s2144_s12 = sphi %s2215_s12, %s21_s12   ;;  %s2140_s11 = sphi %s2213_s11, %s2623_s11   ;;  %s2136_s10 = sphi %s2211_s10, %s2622_s10   ;;  %s2132_s9 = sphi %s2209_s9, %s2621_s9   ;;  %s2128_s30 = sphi %s2207_s30, %s2620_s30   ;;  %s2124_s29 = sphi %s2205_s29, %s2619_s29   ;;  %s2120_s28 = sphi %s2203_s28, %s2625_s28   ;;  %s2116_s27 = sphi %s2201_s27, %s2624_s27  }
   0xa   : > { %2600 = sst [smem:[#allocation7_spill]] %s2124_s29  ;;  %s1695_s14 = sadd.s32 4294967294, %s2144_s12  }
   0xb   : > { %2601 = sst [smem:[#allocation8_spill]] %s2136_s10  ;;  %s30_s15 = sadd.s32 1, %s2136_s10 }
   0xc   : > { %2602 = sst [smem:[#allocation9_spill]] %s2140_s11  ;;  %p31_p0 = scmp.ge.s32.totalorder %s30_s15, 2 }
   0xd   : > { %2603 = sst [smem:[#allocation10_spill]] %s2144_s12  ;;  %s33_s16 = sadd.s32 1, %s2140_s11 }
   0xe   : > { %p258_p1 = scmp.ne.s32.totalorder %s2124_s29, %s2120_s28  ;;  %p259_p2 = scmp.eq.s32.totalorder %s1694_s13, 3 }
   0xf   : > { %s2627_s15 = smov (%p31_p0, %s30_s15), 0  ;;  %s2629_s16 = smov (!%p31_p0, %s33_s16), %s2140_s11 }
  0x10   : > { %2604 = sst [smem:[#allocation11_spill]] %s2627_s15  ;;  %p2250_p3 = por %p259_p2, %p258_p1 }
  0x11   : > { %p264_p4 = scmp.ne.s32.totalorder %s2120_s28, %s2116_s27  ;;  %p35_p5 = scmp.ge.s32.totalorder %s2629_s16, 2 }
  0x12   : > { %p265_p6 = scmp.eq.s32.totalorder %s1695_s14, 3  ;;  %p1698_p7 = scmp.ge.s32.totalorder %s2144_s12, 1 }
  0x13   : > { %p342_p8 = scmp.lt.s32.totalorder %s2144_s12, 5  ;;  %s2631_s16 = smov (%p35_p5, %s2629_s16), 0 }
  0x14   : > { %2606 = sst [smem:[#allocation12_spill]] %s2631_s16  ;;  %p2260_p9 = por %p265_p6, %p264_p4 }
  0x15   : > { %p343_p10 = pnand %p1698_p7, %p342_p8  ;;  %s245_s19 = ssub.s32 %s2140_s11, %s2631_s16 }
  0x16   : > { %s2607_s18 = scalar_select %p2260_p9, 1, 0 }
  0x17   : > { %s248_s20 = sadd.s32 1, %s2124_s29  ;;  %p246_p11 = scmp.eq.s32.totalorder %s245_s19, 0 }
  0x18   : > { %2608 = sst [smem:[#allocation13_spill]] %s2607_s18  ;;  %346 = sbr.rel (%p343_p10) target bundleno = 2616 (0xa38), region = 52 }
  0x19   : > { %s2268_s21 = scalar_select %p246_p11, %s2124_s29, %s248_s20  }
  0x1a   : > { %s2589_s22 = sand.u32 (!%p343_p10), 1, %s2120_s28   ;;  %p406_p12 = scmp.lt.s32.totalorder (!%p343_p10), %s2132_s9, 1 }
  0x1b   : > { %2609 = sst [smem:[#allocation14_spill]] %s2268_s21  ;;  %s1699_s23 = sshll.u32 (!%p343_p10), %s2589_s22, 4 }
  0x1c   : > { %p411_p13 = scmp.lt.s32.totalorder (!%p343_p10), %s2128_s30, 1  ;;  %s2610_s0 = sld [smem:[#allocation15_spill]] (!%p343_p10) }
  0x1d   : > { %s2611_s1 = sld [smem:[#allocation16_spill]] (!%p343_p10)  ;;  %s2612_s3 = sld [smem:[#allocation17_spill]] (!%p343_p10) }
  0x1e   : > { %p1711_p0 = scmp.ne.s32.totalorder (!%p343_p10), %s2128_s30, 0 }
  0x1f   : > { %s407_s24 = scalar_select %p406_p12, %s2132_s9, 1 }
  0x20   : > { %s2277_s25 = scalar_select %p411_p13, %s2128_s30, 1 }
  0x21   : > { %s1746_s26 = sshll.u32 %s407_s24, 4  ;;  %445 = sbr.rel (%p1711_p0) target bundleno = 40 (0x28), region = 56  ;;  %vm448_vm0 = vcmask (!%p1711_p0), 261120  }
  0x22   : > { %s410_s19 = scalar_lea.vmem %s2610_s0, %s1746_s26  ;;  %s1747_s20 = sshll.u32 %s2277_s25, 4 }
  0x23   : > { %s2286_s11 = scalar_lea.vmem %s2611_s1, %s1747_s20  ;;  %s2295_s27 = scalar_lea.vmem %s2612_s3, %s1747_s20  ;;  %v446_v0 = vld [vmem:[%s410_s19] sm:$0xff] (!%p1711_p0)  ;;  %v447_v1 = vld [vmem:[%s410_s19 + $0x8] sm:$0xff] (!%p1711_p0) }
  0x24   : > { %s2300_s13 = scalar_lea.vmem %s2582_s4, %s1747_s20  ;;  %s431_s15 = scalar_lea.vmem %s2583_s5, %s2277_s25  ;;  %449 = vst.msk [vmem:[#allocation2] sm:$0xff] (!%p1711_p0), %vm448_vm0, %v446_v0  ;;  %450 = vst.msk [vmem:[#allocation2 + $0x8] sm:$0xff] (!%p1711_p0), %vm448_vm0, %v447_v1 }
  0x25   : > { %s1750_s16 = sshll.u32 %s2277_s25, 6  ;;  %s1710_s22 = sshll.u32 %s2277_s25, 3 }
  0x26   : > { %s2310_s10 = scalar_lea.vmem %s2584_s6, %s1750_s16  ;;  %s2316_s18 = scalar_lea.vmem %s2585_s7, %s1710_s22 }
  0x27   : > { %s2318_s3 = scalar_lea.vmem [#allocation3], %s1699_s23 }
  0x28 PF: > { %vm454_vm1 = vcmask 261120   ;;  %v1994_v16 = vld [vmem:[%s2286_s11] sm:$0xff]   ;;  %v2146_v17 = vmov 0.0   ;;  %v1995_v18 = vld [vmem:[%s2286_s11 + $0x8] sm:$0xff]   ;;  %vm2147_vm2 = vmmov 0   ;;  %v482_v23 = vlaneseq  ;;  %s2613_s11 = scalar_lea.vmem %s2580_s2, %s2277_s25  ;;  %s2148_s12 = smov 112  }
  0x29   : > { %1791 = vmatprep.subr.bf16.mxu1 %v2146_v17  ;;  %1817 = vmatprep.subr.bf16.mxu0 %v2146_v17  ;;  %v2347_v28 = vld [vmem:[%s2316_s18] sm:$0x3f]  ;;  %s2149_s21 = smov 120   ;;  %s2150_s23 = smov 104   ;;  %vm593_vm3 = vcmask 64512   ;;  %vm799_vm4 = vcmask 130048  }
  0x2a   : > { %1792 = vmatpush3.bf16.msra.mxu1 %v1994_v16  ;;  %1795 = vmatprep.mubr.msk.bf16.mxu1 %vm2147_vm2, %v2146_v17  ;;  %v2343_v26 = vshrl.u32 %v482_v23, 7  ;;  %v1712_v41 = vld [vmem:[%s2613_s11] ss:$0 sm:$0xff]  ;;  %s2151_s19 = smov 96   ;;  %s2152_s20 = smov 64   ;;  %vm1085_vm5 = vcmask 1043456  }
  0x2b   : > { %v2321_v2 = vld [vmem:[#allocation2] sm:$0xff]  ;;  %v2323_v3 = vld [vmem:[#allocation2 + $0x8] sm:$0xff]  ;;  %1793 = vmatprep.subr.bf16.mxu1 %v2146_v17  ;;  %1819 = vmatprep.mubr.msk.bf16.mxu0 %vm2147_vm2, %v2146_v17  ;;  %p1740_p1 = scmp.ne.s32.totalorder %s2128_s30, 1 }
  0x2c   : > { %v455_v4 = vsel %vm454_vm1, %v2321_v2, 0.0  ;;  %v458_v5 = vsel %vm454_vm1, %v2323_v3, 0.0  ;;  %v484_v27 = vsub.s32 0, %v2343_v26  ;;  %v490_v32 = vsub.s32 1, %v2343_v26 }
  0x2d   : > { %456 = vadd.xlane.f32.xlu0 %v455_v4 }
  0x2e   : > { %1794 = vmatpush3.bf16.msra.mxu1 %v1995_v18  ;;  %v485_v31 = vrot.slane %v2347_v28, %v484_v27  ;;  %v491_v36 = vrot.slane %v2347_v28, %v490_v32 }
  0x2f   : > { %1799 = vmatprep.subr.bf16.mxu1 %v2146_v17 }
  0x31   : > { %459 = vadd.xlane.f32.xlu0 %v458_v5 }
  0xba   : > { %v457_v6 = vpop.xlane.xlu0 %456 }
  0xbb   : > { %v462_v7 = vmul.f32 0.03125, %v457_v6 }
  0xbd   : > { %v464_v8 = vsub.f32 %v2321_v2, %v462_v7 }
  0xbe   : > { %v460_v9 = vpop.xlane.xlu0 %459 }
  0xbf   : > { %v463_v10 = vmul.f32 0.03125, %v460_v9  ;;  %v466_v11 = vmul.f32 %v464_v8, %v464_v8 }
  0xc1   : > { %v465_v12 = vsub.f32 %v2323_v3, %v463_v10  ;;  %v468_v13 = vsel %vm454_vm1, %v466_v11, 0.0 }
  0xc2   : > { %469 = vadd.xlane.f32.xlu1 %v468_v13 }
  0xc3   : > { %v467_v14 = vmul.f32 %v465_v12, %v465_v12 }
  0xc5   : > { %v471_v15 = vsel %vm454_vm1, %v467_v14, 0.0 }
  0xc6   : > { %472 = vadd.xlane.f32.xlu1 %v471_v15 }
 0x14f   : > { %v470_v19 = vpop.xlane.xlu1 %469 }
 0x150   : > { %v474_v20 = vmul.f32 0.03125, %v470_v19 }
 0x152   : > { %v476_v21 = vadd.f32 1e-05, %v474_v20 }
 0x153   : > { %v473_v22 = vpop.xlane.xlu1 %472 }
 0x154   : > { %2006 = vrsqrt.f32 %v476_v21  ;;  %v475_v24 = vmul.f32 0.03125, %v473_v22 }
 0x156   : > { %v477_v25 = vadd.f32 1e-05, %v475_v24 }
 0x158   : > { %2008 = vrsqrt.f32 %v477_v25 }
 0x15e   : > { %v2007_v29 = vpop.eup %2006 }
 0x15f   : > { %v480_v30 = vmul.f32 %v2007_v29, %v464_v8 }
 0x161   : > { %v486_v35 = vmul.f32 %v485_v31, %v480_v30 }
 0x162   : > { %v2009_v33 = vpop.eup %2008 }
 0x163   : > { %v481_v34 = vmul.f32 %v2009_v33, %v465_v12  ;;  %v492_v38 = vadd.f32 %v491_v36, %v486_v35 }
 0x165   : > { %v487_v37 = vmul.f32 %v485_v31, %v481_v34 }
 0x167   : > { %v493_v39 = vadd.f32 %v491_v36, %v487_v37 }
 0x169   : > { %v494_v40 = vpack.c.bf16 %v493_v39, %v492_v38 }
 0x16b   : > { %1796 = vmatmul.mubr.msk.bf16.vlgmr.msra.gmra.mrb[0].mxu1 %vm454_vm1, %v494_v40 }
 0x16c   : > { %1801 = vmatprep.mubr.msk.bf16.mxu1 %vm2147_vm2, %v2146_v17 }
 0x23e   : > { %v555_v42 = vpop.f32.mrb[0].mxu1 }
 0x23f   : > { %v1797_v43 = vpop.f32.mrb[1].mxu1  ;;  %v556_v45 = vadd.f32 %v1712_v41, %v555_v42 }
 0x240   : > { %v558_v44 = vpop.f32.mrb[2].mxu1 }
 0x241   : > { %v559_v46 = vadd.f32 %v1712_v41, %v558_v44  ;;  %v1798_v47 = vpop.f32.mrb[3].mxu1 }
 0x243   : > { %v1984_v48 = vpack.i.bf16 %v559_v46, %v556_v45  ;;  %v2360_v49 = vpack.c.bf16 %v559_v46, %v556_v45 }
 0x245   : > { %1985 = vrot.lane.b32.xlu1 %v1984_v48, %s2148_s12  ;;  %1980 = vrot.lane.b32.xlu0 %v1984_v48, %s2149_s21 }
 0x249   : > { %1990 = vrot.lane.b32.xlu1 %v1984_v48, %s2150_s23 }
 0x24d   : > { %591 = vrot.lane.b32.xlu1 %v2360_v49, %s2151_s19 }
 0x2b7   : > { %v1986_v50 = vpop.permute.xlu1 %1985  ;;  %v1981_v51 = vpop.permute.xlu0 %1980 }
 0x2b8   : > { %v1988_v52 = vunpack.i.h.bf16 %v1986_v50  ;;  %v1987_v53 = vunpack.i.l.bf16 %v1986_v50  ;;  %v1983_v54 = vunpack.i.h.bf16 %v1981_v51  ;;  %v1982_v55 = vunpack.i.l.bf16 %v1981_v51 }
 0x2ba   : > { %v2363_v56 = vpack.c.bf16 %v1988_v52, %v1987_v53  ;;  %v2365_v57 = vpack.c.bf16 %v1983_v54, %v1982_v55 }
 0x2bb   : > { %v1991_v58 = vpop.permute.xlu1 %1990 }
 0x2bc   : > { %v1993_v59 = vunpack.i.h.bf16 %v1991_v58  ;;  %v1992_v60 = vunpack.i.l.bf16 %v1991_v58  ;;  %642 = vrot.lane.b32.xlu0 %v2365_v57, %s2151_s19  ;;  %692 = vrot.lane.b32.xlu1 %v2363_v56, %s2151_s19 }
 0x2be   : > { %v2369_v61 = vpack.c.bf16 %v1993_v59, %v1992_v60 }
 0x2bf   : > { %v592_v62 = vpop.permute.xlu1 %591 }
 0x2c0   : > { %v598_v63 = vsel %vm593_vm3, %v592_v62, 0  ;;  %742 = vrot.lane.b32.xlu0 %v2369_v61, %s2151_s19 }
 0x2c1   : > { %1800 = vmatpush3.bf16.xpose.msra.mxu1 %v598_v63 }
 0x2c2   : > { %1805 = vmatprep.subr.bf16.mxu1 %v2146_v17 }
 0x2c8   : > { %1802 = vmatmul.mubr.msk.bf16.vlgmr.msra.gmra.mrb[4].mxu1 %vm593_vm3, %v2360_v49 }
 0x2c9   : > { %1807 = vmatprep.mubr.msk.bf16.mxu1 %vm2147_vm2, %v2146_v17 }
 0x32e   : > { %v643_v0 = vpop.permute.xlu0 %642  ;;  %v693_v6 = vpop.permute.xlu1 %692 }
 0x32f   : > { %v648_v1 = vsel %vm593_vm3, %v643_v0, 0  ;;  %v698_v7 = vsel %vm593_vm3, %v693_v6, 0 }
 0x330   : > { %1806 = vmatpush3.bf16.xpose.msra.mxu1 %v648_v1 }
 0x331   : > { %1811 = vmatprep.subr.bf16.mxu1 %v2146_v17 }
 0x332   : > { %v743_v4 = vpop.permute.xlu0 %742 }
 0x333   : > { %v748_v5 = vsel %vm593_vm3, %v743_v4, 0 }
 0x334   : > { %1818 = vmatpush3.bf16.xpose.msra.mxu0 %v748_v5 }
 0x335   : > { %1829 = vmatprep.subr.bf16.mxu0 %v2146_v17 }
 0x337   : > { %1808 = vmatmul.mubr.msk.bf16.vlgmr.msra.gmra.mrb[8].mxu1 %vm593_vm3, %v2365_v57 }
 0x338   : > { %1812 = vmatpush3.bf16.xpose.msra.mxu1 %v698_v7  ;;  %1813 = vmatprep.mubr.msk.bf16.mxu1 %vm2147_vm2, %v2146_v17 }
 0x339   : > { %1823 = vmatprep.subr.bf16.mxu1 %v2146_v17 }
 0x33b   : > { %1820 = vmatmul.mubr.msk.bf16.vlgmr.msra.gmra.mrb[0].mxu0 %vm593_vm3, %v2369_v61 }
 0x33c   : > { %1831 = vmatprep.mubr.msk.bf16.mxu0 %vm2147_vm2, %v2146_v17 }
 0x33f   : > { %1814 = vmatmul.mubr.msk.bf16.vlgmr.msra.gmra.mrb[12].mxu1 %vm593_vm3, %v2363_v56 }
 0x340   : > { %1825 = vmatprep.mubr.msk.bf16.mxu1 %vm2147_vm2, %v2146_v17 }
 0x39b   : > { %v634_v8 = vpop.f32.mrb[4].mxu1 }
 0x39c   : > { %v791_v9 = vmul.f32 0.35355338, %v634_v8  ;;  %v1803_v10 = vpop.f32.mrb[5].mxu1 }
 0x39d   : > { %v637_v11 = vpop.f32.mrb[6].mxu1 }
 0x39e   : > { %v792_v12 = vmul.f32 0.35355338, %v637_v11  ;;  %v1804_v13 = vpop.f32.mrb[7].mxu1  ;;  %v800_v14 = vsel %vm799_vm4, %v791_v9, -inf }
 0x39f   : > { %801 = vmax.xlane.f32.xlu1 %v800_v14 }
 0x3a0   : > { %v803_v15 = vsel %vm799_vm4, %v792_v12, -inf }
 0x3a1   : > { %804 = vmax.xlane.f32.xlu0 %v803_v15 }
 0x40a   : > { %v684_v16 = vpop.f32.mrb[8].mxu1 }
 0x40b   : > { %v793_v18 = vmul.f32 0.35355338, %v684_v16  ;;  %v1809_v19 = vpop.f32.mrb[9].mxu1 }
 0x40c   : > { %v687_v20 = vpop.f32.mrb[10].mxu1 }
 0x40d   : > { %v794_v21 = vmul.f32 0.35355338, %v687_v20  ;;  %v1810_v22 = vpop.f32.mrb[11].mxu1  ;;  %v806_v23 = vsel %vm799_vm4, %v793_v18, -inf }
 0x40e   : > { %v784_v24 = vpop.f32.mrb[0].mxu0  ;;  %807 = vmax.xlane.f32.xlu0 %v806_v23 }
 0x40f   : > { %v1821_v25 = vpop.f32.mrb[1].mxu0  ;;  %v809_v30 = vsel %vm799_vm4, %v794_v21, -inf  ;;  %v797_v35 = vmul.f32 0.35355338, %v784_v24 }
 0x410   : > { %v787_v27 = vpop.f32.mrb[2].mxu0 }
 0x411   : > { %v1822_v29 = vpop.f32.mrb[3].mxu0  ;;  %v798_v39 = vmul.f32 0.35355338, %v787_v27  ;;  %v818_v41 = vsel %vm799_vm4, %v797_v35, -inf }
 0x412   : > { %810 = vmax.xlane.f32.xlu0 %v809_v30  ;;  %v734_v31 = vpop.f32.mrb[12].mxu1 }
 0x413   : > { %v795_v32 = vmul.f32 0.35355338, %v734_v31  ;;  %v1815_v33 = vpop.f32.mrb[13].mxu1  ;;  %v821_v42 = vsel %vm799_vm4, %v798_v39, -inf }
 0x414   : > { %v737_v34 = vpop.f32.mrb[14].mxu1 }
 0x415   : > { %v796_v36 = vmul.f32 0.35355338, %v737_v34  ;;  %v1816_v37 = vpop.f32.mrb[15].mxu1  ;;  %v812_v38 = vsel %vm799_vm4, %v795_v32, -inf }
 0x416   : > { %813 = vmax.xlane.f32.xlu1 %v812_v38 }
 0x417   : > { %v815_v40 = vsel %vm799_vm4, %v796_v36, -inf }
 0x418   : > { %816 = vmax.xlane.f32.xlu0 %v815_v40 }
 0x41a   : > { %819 = vmax.xlane.f32.xlu1 %v818_v41 }
 0x41c   : > { %822 = vmax.xlane.f32.xlu0 %v821_v42 }
 0x42b   : > { %892 = vrot.lane.b32.xlu1 %v2360_v49, %s2152_s20 }
 0x42c   : > { %v802_v46 = vpop.xlane.xlu1 %801 }
 0x42d   : > { %v824_v47 = vsub.f32 %v791_v9, %v802_v46 }
 0x42e   : > { %v805_v43 = vpop.xlane.xlu0 %804 }
 0x42f   : > { %v825_v44 = vsub.f32 %v792_v12, %v805_v43  ;;  %v832_v50 = vmul.f32 1.442695, %v824_v47 }
 0x431   : > { %v834_v45 = vmul.f32 1.442695, %v825_v44 }
 0x433   : > { %2010 = vpow2.f32 %v834_v45 }
 0x434   : > { %2012 = vpow2.f32 %v832_v50 }
 0x43d   : > { %v2011_v48 = vpop.eup %2010 }
 0x43e   : > { %v851_v51 = vsel %vm799_vm4, %v2011_v48, 0.0  ;;  %v2013_v52 = vpop.eup %2012 }
 0x43f   : > { %852 = vadd.xlane.f32.xlu0 %v851_v51  ;;  %v848_v53 = vsel %vm799_vm4, %v2013_v52, 0.0 }
 0x44f   : > { %849 = vadd.xlane.f32.xlu1 %v848_v53 }
 0x49b   : > { %v808_v54 = vpop.xlane.xlu0 %807 }
 0x49c   : > { %v826_v55 = vsub.f32 %v793_v18, %v808_v54 }
 0x49e   : > { %v836_v58 = vmul.f32 1.442695, %v826_v55 }
 0x49f   : > { %v811_v49 = vpop.xlane.xlu0 %810 }
 0x4a0   : > { %2014 = vpow2.f32 %v836_v58  ;;  %v827_v59 = vsub.f32 %v794_v21, %v811_v49 }
 0x4a2   : > { %v838_v60 = vmul.f32 1.442695, %v827_v59 }
 0x4a3   : > { %v814_v62 = vpop.xlane.xlu1 %813 }
 0x4a4   : > { %2016 = vpow2.f32 %v838_v60  ;;  %v828_v63 = vsub.f32 %v795_v32, %v814_v62  ;;  %v563_v60 = vld [vmem:[%s2295_s27 + $0x4] sm:$0xf] }
 0x4a5   : > { %v817_v0 = vpop.xlane.xlu0 %816  ;;  %v1087_v62 = vsel %vm1085_vm5, %v563_v60, 0 }
 0x4a6   : > { %v829_v4 = vsub.f32 %v796_v36, %v817_v0  ;;  %v840_v6 = vmul.f32 1.442695, %v828_v63  ;;  %v565_v0 = vld [vmem:[%s2295_s27 + $0xc] sm:$0xf] }
 0x4a7   : > { %v820_v1 = vpop.xlane.xlu1 %819 }
 0x4a8   : > { %v830_v5 = vsub.f32 %v797_v35, %v820_v1  ;;  %v842_v13 = vmul.f32 1.442695, %v829_v4 }
 0x4a9   : > { %v823_v7 = vpop.xlane.xlu0 %822 }
 0x4aa   : > { %v2015_v8 = vpop.eup %2014  ;;  %v844_v9 = vmul.f32 1.442695, %v830_v5  ;;  %v831_v10 = vsub.f32 %v798_v39, %v823_v7  ;;  %v1232_v7 = vsel %vm1085_vm5, %v565_v0, 0 }
 0x4ab   : > { %v893_v11 = vpop.permute.xlu1 %892  ;;  %v854_v12 = vsel %vm799_vm4, %v2015_v8, 0.0 }
 0x4ac   : > { %2018 = vpow2.f32 %v844_v9  ;;  %v846_v14 = vmul.f32 1.442695, %v831_v10  ;;  %855 = vadd.xlane.f32.xlu1 %v854_v12  ;;  %1824 = vmatpush3.bf16.msra.mxu1 %v893_v11  ;;  %v564_v9 = vld [vmem:[%s2295_s27 + $0x8] sm:$0xf] }
 0x4ad   : > { %2020 = vpow2.f32 %v840_v6  ;;  %1835 = vmatprep.subr.bf16.mxu1 %v2146_v17 }
 0x4ae   : > { %v2017_v15 = vpop.eup %2016  ;;  %2022 = vpow2.f32 %v846_v14  ;;  %v1182_v14 = vsel %vm1085_vm5, %v564_v9, 0 }
 0x4af   : > { %v857_v16 = vsel %vm799_vm4, %v2017_v15, 0.0  ;;  %2024 = vpow2.f32 %v842_v13 }
 0x4b0   : > { %858 = vadd.xlane.f32.xlu0 %v857_v16 }
 0x4b6   : > { %v2019_v18 = vpop.eup %2018 }
 0x4b7   : > { %v2021_v19 = vpop.eup %2020  ;;  %v866_v20 = vsel %vm799_vm4, %v2019_v18, 0.0 }
 0x4b8   : > { %v2023_v21 = vpop.eup %2022  ;;  %867 = vadd.xlane.f32.xlu1 %v866_v20  ;;  %v860_v24 = vsel %vm799_vm4, %v2021_v19, 0.0 }
 0x4b9   : > { %v869_v22 = vsel %vm799_vm4, %v2023_v21, 0.0  ;;  %v2025_v23 = vpop.eup %2024 }
 0x4ba   : > { %870 = vadd.xlane.f32.xlu0 %v869_v22  ;;  %v863_v25 = vsel %vm799_vm4, %v2025_v23, 0.0 }
 0x4bc   : > { %861 = vadd.xlane.f32.xlu1 %v860_v24 }
 0x4be   : > { %864 = vadd.xlane.f32.xlu0 %v863_v25 }
 0x4cc   : > { %v853_v27 = vpop.xlane.xlu0 %852 }
 0x4cd   : > { %986 = vrot.lane.b32.xlu1 %v2363_v56, %s2152_s20  ;;  %2026 = vrcp.f32 %v853_v27 }
 0x4d1   : > { %1033 = vrot.lane.b32.xlu1 %v2369_v61, %s2152_s20 }
 0x4d4   : > { %939 = vrot.lane.b32.xlu0 %v2365_v57, %s2152_s20 }
 0x4d7   : > { %v2027_v30 = vpop.eup %2026 }
 0x4d8   : > { %v881_v32 = vmul.f32 %v2027_v30, %v2011_v48 }
 0x4dc   : > { %v850_v29 = vpop.xlane.xlu1 %849 }
 0x4dd   : > { %2028 = vrcp.f32 %v850_v29 }
 0x4e7   : > { %v2029_v31 = vpop.eup %2028 }
 0x4e8   : > { %v880_v33 = vmul.f32 %v2029_v31, %v2013_v52  ;;  %v562_v52 = vld [vmem:[%s2295_s27] sm:$0xf] }
 0x4e9   : > { %v1134_v59 = vsel %vm1085_vm5, %v562_v52, 0 }
 0x4ea   : > { %v888_v34 = vpack.c.bf16 %v881_v32, %v880_v33 }
 0x4ec   : > { %1826 = vmatmul.mubr.msk.bf16.vlgmr.msra.gmra.mrb[16].mxu1 %vm799_vm4, %v888_v34 }
 0x4ed   : > { %1837 = vmatprep.mubr.msk.bf16.mxu1 %vm2147_vm2, %v2146_v17 }
 0x539   : > { %v856_v35 = vpop.xlane.xlu1 %855 }
 0x53d   : > { %v859_v56 = vpop.xlane.xlu0 %858 }
 0x53e   : > { %2030 = vrcp.f32 %v859_v56 }
 0x53f   : > { %2032 = vrcp.f32 %v856_v35 }
 0x545   : > { %v868_v61 = vpop.xlane.xlu1 %867 }
 0x547   : > { %v871_v57 = vpop.xlane.xlu0 %870 }
 0x548   : > { %2034 = vrcp.f32 %v871_v57  ;;  %v2031_v37 = vpop.eup %2030  ;;  %v1279_v57 = vsub.s32 4, %v2343_v26 }
 0x549   : > { %2036 = vrcp.f32 %v868_v61  ;;  %v862_v36 = vpop.xlane.xlu1 %861  ;;  %v2033_v39 = vpop.eup %2032  ;;  %v883_v40 = vmul.f32 %v2031_v37, %v2017_v15 }
 0x54a   : > { %2038 = vrcp.f32 %v862_v36  ;;  %v882_v42 = vmul.f32 %v2033_v39, %v2015_v8  ;;  %v1280_v39 = vrot.slane %v2347_v28, %v1279_v57 }
 0x54b   : > { %v865_v38 = vpop.xlane.xlu0 %864 }
 0x54c   : > { %2040 = vrcp.f32 %v865_v38  ;;  %v889_v44 = vpack.c.bf16 %v883_v40, %v882_v42 }
 0x54d   : > { %v987_v41 = vpop.permute.xlu1 %986 }
 0x54e   : > { %1836 = vmatpush3.bf16.msra.mxu1 %v987_v41 }
 0x54f   : > { %v940_v43 = vpop.permute.xlu0 %939  ;;  %1847 = vmatprep.subr.bf16.mxu1 %v2146_v17 }
 0x550   : > { %1830 = vmatpush3.bf16.msra.mxu0 %v940_v43 }
 0x551   : > { %1841 = vmatprep.subr.bf16.mxu0 %v2146_v17  ;;  %v1034_v47 = vpop.permute.xlu1 %1033 }
 0x552   : > { %v2035_v45 = vpop.eup %2034 }
 0x553   : > { %v2037_v46 = vpop.eup %2036  ;;  %1832 = vmatmul.mubr.msk.bf16.vlgmr.msra.gmra.mrb[4].mxu0 %vm799_vm4, %v889_v44  ;;  %v887_v50 = vmul.f32 %v2035_v45, %v2023_v21 }
 0x554   : > { %v2039_v48 = vpop.eup %2038  ;;  %1842 = vmatpush3.bf16.msra.mxu0 %v1034_v47  ;;  %1843 = vmatprep.mubr.msk.bf16.mxu0 %vm2147_vm2, %v2146_v17  ;;  %v886_v53 = vmul.f32 %v2037_v46, %v2019_v18 }
 0x555   : > { %1853 = vmatprep.subr.bf16.mxu0 %v2146_v17  ;;  %v884_v54 = vmul.f32 %v2039_v48, %v2021_v19 }
 0x556   : > { %v2041_v51 = vpop.eup %2040  ;;  %v891_v49 = vpack.c.bf16 %v887_v50, %v886_v53 }
 0x557   : > { %v885_v55 = vmul.f32 %v2041_v51, %v2025_v23 }
 0x559   : > { %v890_v58 = vpack.c.bf16 %v885_v55, %v884_v54 }
 0x55b   : > { %1838 = vmatmul.mubr.msk.bf16.vlgmr.msra.gmra.mrb[20].mxu1 %vm799_vm4, %v890_v58  ;;  %1844 = vmatmul.mubr.msk.bf16.vlgmr.msra.gmra.mrb[8].mxu0 %vm799_vm4, %v891_v49 }
 0x55c   : > { %1854 = vmatpush3.bf16.msra.mxu0 %v1134_v59  ;;  %1855 = vmatprep.mubr.msk.bf16.mxu0 %vm2147_vm2, %v2146_v17 }
 0x55d   : > { %1849 = vmatprep.mubr.msk.bf16.mxu1 %vm2147_vm2, %v2146_v17  ;;  %1865 = vmatprep.subr.bf16.mxu0 %v2146_v17 }
 0x55e   : > { %1848 = vmatpush3.bf16.msra.mxu1 %v1087_v62 }
 0x55f   : > { %1859 = vmatprep.subr.bf16.mxu1 %v2146_v17 }
 0x5bf   : > { %v932_v63 = vpop.f32.mrb[16].mxu1 }
 0x5c0   : > { %v1827_v1 = vpop.f32.mrb[17].mxu1 }
 0x5c1   : > { %v935_v4 = vpop.f32.mrb[18].mxu1 }
 0x5c2   : > { %v1080_v5 = vpack.c.bf16 %v935_v4, %v932_v63  ;;  %v1828_v6 = vpop.f32.mrb[19].mxu1  ;;  %v1996_v4 = vld [vmem:[%s2300_s13] sm:$0xff]  }
 0x5c4   : > { %1856 = vmatmul.mubr.msk.bf16.vlgmr.msra.gmra.mrb[12].mxu0 %vm593_vm3, %v1080_v5  ;;  %v1997_v5 = vld [vmem:[%s2300_s13 + $0x8] sm:$0xff]  }
 0x5c5   : > { %1866 = vmatpush3.bf16.msra.mxu0 %v1232_v7  ;;  %1867 = vmatprep.mubr.msk.bf16.mxu0 %vm2147_vm2, %v2146_v17 }
 0x5c6   : > { %1879 = vmatprep.subr.bf16.mxu0 %v2146_v17 }
 0x626   : > { %v979_v8 = vpop.f32.mrb[4].mxu0 }
 0x627   : > { %v1833_v10 = vpop.f32.mrb[5].mxu0 }
 0x628   : > { %v982_v11 = vpop.f32.mrb[6].mxu0 }
 0x629   : > { %v1081_v12 = vpack.c.bf16 %v982_v11, %v979_v8  ;;  %v1834_v13 = vpop.f32.mrb[7].mxu0 }
 0x62b   : > { %1850 = vmatmul.mubr.msk.bf16.vlgmr.msra.gmra.mrb[24].mxu1 %vm593_vm3, %v1081_v12  ;;  %v1313_v12 = vsub.s32 2, %v2343_v26 }
 0x62c   : > { %1860 = vmatpush3.bf16.msra.mxu1 %v1182_v14  ;;  %1861 = vmatprep.mubr.msk.bf16.mxu1 %vm2147_vm2, %v2146_v17 }
 0x62d   : > { %1871 = vmatprep.subr.bf16.mxu1 %v2146_v17  ;;  %v1314_v14 = vrot.slane %v2347_v28, %v1313_v12 }
 0x62e   : > { %v1026_v15 = vpop.f32.mrb[20].mxu1  ;;  %v1073_v16 = vpop.f32.mrb[8].mxu0 }
 0x62f   : > { %v1839_v18 = vpop.f32.mrb[21].mxu1  ;;  %v1845_v19 = vpop.f32.mrb[9].mxu0 }
 0x630   : > { %v1029_v20 = vpop.f32.mrb[22].mxu1  ;;  %v1076_v21 = vpop.f32.mrb[10].mxu0 }
 0x631   : > { %v1177_v22 = vpack.c.bf16 %v1029_v20, %v1026_v15  ;;  %v1227_v23 = vpack.c.bf16 %v1076_v21, %v1073_v16  ;;  %v1840_v24 = vpop.f32.mrb[23].mxu1  ;;  %v1846_v25 = vpop.f32.mrb[11].mxu0  ;;  %v1319_v16 = vsub.s32 3, %v2343_v26 }
 0x633   : > { %1862 = vmatmul.mubr.msk.bf16.vlgmr.msra.gmra.mrb[28].mxu1 %vm593_vm3, %v1177_v22  ;;  %1868 = vmatmul.mubr.msk.bf16.vlgmr.msra.gmra.mrb[16].mxu0 %vm593_vm3, %v1227_v23  ;;  %v1320_v21 = vrot.slane %v2347_v28, %v1319_v16 }
 0x634   : > { %1875 = vmatprep.mubr.msk.bf16.mxu1 %vm2147_vm2, %v2146_v17  ;;  %1895 = vmatprep.mubr.msk.bf16.mxu0 %vm2147_vm2, %v2146_v17 }
 0x635   : > { %1872 = vmatpush3.bf16.msra.mxu1 %v1996_v4 }
 0x636   : > { %1873 = vmatprep.subr.bf16.mxu1 %v2146_v17 }
 0x639   : > { %1874 = vmatpush3.bf16.msra.mxu1 %v1997_v5 }
 0x697   : > { %v1170_v27 = vpop.f32.mrb[12].mxu0 }
 0x698   : > { %v1857_v29 = vpop.f32.mrb[13].mxu0 }
 0x699   : > { %v1173_v30 = vpop.f32.mrb[14].mxu0  ;;  %v1999_v29 = vld [vmem:[%s2310_s10 + $0x8] sm:$0xff]  }
 0x69a   : > { %v1858_v31 = vpop.f32.mrb[15].mxu0 }
 0x69b   : > { %v2001_v31 = vld [vmem:[%s2310_s10 + $0x18] sm:$0xff]  }
 0x6fe   : > { %v1123_v32 = vpop.f32.mrb[24].mxu1 }
 0x6ff   : > { %v1171_v33 = vadd.f32 %v1170_v27, %v1123_v32  ;;  %v1851_v34 = vpop.f32.mrb[25].mxu1  ;;  %v1998_v27 = vld [vmem:[%s2310_s10] sm:$0xff]  }
 0x700   : > { %v1126_v56 = vpop.f32.mrb[26].mxu1  ;;  %1880 = vmatpush3.bf16.msra.mxu0 %v1998_v27  ;;  %v2002_v32 = vld [vmem:[%s2310_s10 + $0x20] sm:$0xff]   ;;  %v2004_v34 = vld [vmem:[%s2310_s10 + $0x30] sm:$0xff]  }
 0x701   : > { %v1174_v35 = vadd.f32 %v1173_v30, %v1126_v56  ;;  %v1852_v61 = vpop.f32.mrb[27].mxu1  ;;  %1881 = vmatprep.subr.bf16.mxu0 %v2146_v17  ;;  %v2000_v30 = vld [vmem:[%s2310_s10 + $0x10] sm:$0xff]   ;;  %v2005_v56 = vld [vmem:[%s2310_s10 + $0x38] sm:$0xff]  }
 0x704   : > { %1882 = vmatpush3.bf16.msra.mxu0 %v1999_v29 }
 0x705   : > { %1883 = vmatprep.subr.bf16.mxu0 %v2146_v17 }
 0x706   : > { %v1218_v36 = vpop.f32.mrb[28].mxu1  ;;  %v1268_v37 = vpop.f32.mrb[16].mxu0 }
 0x707   : > { %v1225_v38 = vadd.f32 %v1218_v36, %v1171_v33  ;;  %v1863_v40 = vpop.f32.mrb[29].mxu1  ;;  %v1869_v41 = vpop.f32.mrb[17].mxu0  ;;  %v2003_v33 = vld [vmem:[%s2310_s10 + $0x28] sm:$0xff]  }
 0x708   : > { %v1221_v42 = vpop.f32.mrb[30].mxu1  ;;  %v1271_v43 = vpop.f32.mrb[18].mxu0  ;;  %1884 = vmatpush3.bf16.msra.mxu0 %v2000_v30 }
 0x709   : > { %v1275_v44 = vadd.f32 %v1268_v37, %v1225_v38  ;;  %v1226_v45 = vadd.f32 %v1221_v42, %v1174_v35  ;;  %v1864_v46 = vpop.f32.mrb[31].mxu1  ;;  %v1870_v47 = vpop.f32.mrb[19].mxu0  ;;  %1885 = vmatprep.subr.bf16.mxu0 %v2146_v17  ;;  %v1728_v35 = vld [vmem:[%s431_s15] ss:$0 sm:$0xff] }
 0x70b   : > { %v1281_v48 = vadd.f32 %v1280_v39, %v1275_v44  ;;  %v1276_v50 = vadd.f32 %v1271_v43, %v1226_v45 }
 0x70c   : > { %1886 = vmatpush3.bf16.msra.mxu0 %v2001_v31 }
 0x70d   : > { %v2463_v51 = vadd.f32 %v1281_v48, %v2321_v2  ;;  %v1282_v52 = vadd.f32 %v1280_v39, %v1276_v50  ;;  %1887 = vmatprep.subr.bf16.mxu0 %v2146_v17 }
 0x70f   : > { %v2466_v53 = vadd.f32 %v1282_v52, %v2323_v3  ;;  %v1285_v54 = vsel %vm454_vm1, %v2463_v51, 0.0 }
 0x710   : > { %1286 = vadd.xlane.f32.xlu1 %v1285_v54  ;;  %1888 = vmatpush3.bf16.msra.mxu0 %v2002_v32 }
 0x711   : > { %v1288_v55 = vsel %vm454_vm1, %v2466_v53, 0.0  ;;  %1889 = vmatprep.subr.bf16.mxu0 %v2146_v17 }
 0x712   : > { %1289 = vadd.xlane.f32.xlu0 %v1288_v55 }
 0x714   : > { %1890 = vmatpush3.bf16.msra.mxu0 %v2003_v33 }
 0x715   : > { %1891 = vmatprep.subr.bf16.mxu0 %v2146_v17 }
 0x718   : > { %1892 = vmatpush3.bf16.msra.mxu0 %v2004_v34 }
 0x719   : > { %1893 = vmatprep.subr.bf16.mxu0 %v2146_v17 }
 0x71c   : > { %1894 = vmatpush3.bf16.msra.mxu0 %v2005_v56 }
 0x79d   : > { %v1287_v58 = vpop.xlane.xlu1 %1286 }
 0x79e   : > { %v1291_v49 = vmul.f32 0.03125, %v1287_v58 }
 0x79f   : > { %v1290_v59 = vpop.xlane.xlu0 %1289 }
 0x7a0   : > { %v1293_v2 = vsub.f32 %v2463_v51, %v1291_v49  ;;  %v1292_v60 = vmul.f32 0.03125, %v1290_v59 }
 0x7a2   : > { %v1294_v62 = vsub.f32 %v2466_v53, %v1292_v60  ;;  %v1295_v3 = vmul.f32 %v1293_v2, %v1293_v2 }
 0x7a4   : > { %v1297_v63 = vsel %vm454_vm1, %v1295_v3, 0.0  ;;  %v1296_v0 = vmul.f32 %v1294_v62, %v1294_v62 }
 0x7a5   : > { %1298 = vadd.xlane.f32.xlu0 %v1297_v63 }
 0x7a6   : > { %v1300_v1 = vsel %vm454_vm1, %v1296_v0, 0.0 }
 0x7a9   : > { %1301 = vadd.xlane.f32.xlu0 %v1300_v1 }
 0x832   : > { %v1299_v6 = vpop.xlane.xlu0 %1298 }
 0x833   : > { %v1303_v7 = vmul.f32 0.03125, %v1299_v6 }
 0x835   : > { %v1305_v8 = vadd.f32 1e-05, %v1303_v7 }
 0x836   : > { %v1302_v9 = vpop.xlane.xlu0 %1301 }
 0x837   : > { %2042 = vrsqrt.f32 %v1305_v8  ;;  %v1304_v10 = vmul.f32 0.03125, %v1302_v9 }
 0x839   : > { %v1306_v11 = vadd.f32 1e-05, %v1304_v10 }
 0x83b   : > { %2044 = vrsqrt.f32 %v1306_v11 }
 0x841   : > { %v2043_v13 = vpop.eup %2042 }
 0x842   : > { %v1309_v15 = vmul.f32 %v2043_v13, %v1293_v2 }
 0x844   : > { %v1315_v19 = vmul.f32 %v1314_v14, %v1309_v15 }
 0x845   : > { %v2045_v18 = vpop.eup %2044 }
 0x846   : > { %v1310_v20 = vmul.f32 %v2045_v18, %v1294_v62  ;;  %v1321_v23 = vadd.f32 %v1320_v21, %v1315_v19  ;;  %v1428_v62 = vsub.s32 5, %v2343_v26 }
 0x848   : > { %v1316_v22 = vmul.f32 %v1314_v14, %v1310_v20  ;;  %v1429_v3 = vrot.slane %v2347_v28, %v1428_v62 }
 0x84a   : > { %v1322_v24 = vadd.f32 %v1320_v21, %v1316_v22 }
 0x84c   : > { %v1323_v25 = vpack.c.bf16 %v1322_v24, %v1321_v23 }
 0x84e   : > { %1876 = vmatmul.mubr.msk.bf16.vlgmr.msra.gmra.mrb[32].mxu1 %vm454_vm1, %v1323_v25 }
 0x921   : > { %v1384_v61 = vpop.f32.mrb[32].mxu1 }
 0x922   : > { %v1385_v57 = vadd.f32 %v1728_v35, %v1384_v61  ;;  %v1877_v36 = vpop.f32.mrb[33].mxu1 }
 0x923   : > { %v1387_v37 = vpop.f32.mrb[34].mxu1 }
 0x924   : > { %v1391_v38 = vmul.f32 %v1385_v57, %v1385_v57  ;;  %v1388_v39 = vadd.f32 %v1728_v35, %v1387_v37  ;;  %v1878_v40 = vpop.f32.mrb[35].mxu1 }
 0x926   : > { %v1393_v41 = vmul.f32 %v1391_v38, %v1385_v57  ;;  %v1392_v42 = vmul.f32 %v1388_v39, %v1388_v39 }
 0x928   : > { %v1395_v43 = vmul.f32 0.044715, %v1393_v41  ;;  %v1394_v44 = vmul.f32 %v1392_v42, %v1388_v39 }
 0x92a   : > { %v1397_v45 = vadd.f32 %v1395_v43, %v1385_v57  ;;  %v1396_v17 = vmul.f32 0.044715, %v1394_v44 }
 0x92c   : > { %v1399_v46 = vmul.f32 0.7978846, %v1397_v45  ;;  %v1398_v47 = vadd.f32 %v1396_v17, %v1388_v39 }
 0x92e   : > { %2046 = vtanh.f32 %v1399_v46  ;;  %v1400_v48 = vmul.f32 0.7978846, %v1398_v47 }
 0x930   : > { %2048 = vtanh.f32 %v1400_v48 }
 0x938   : > { %v2047_v50 = vpop.eup %2046 }
 0x939   : > { %v1403_v52 = vadd.f32 1.0, %v2047_v50 }
 0x93a   : > { %v2049_v54 = vpop.eup %2048 }
 0x93b   : > { %v1405_v55 = vmul.f32 0.5, %v1403_v52  ;;  %v1404_v58 = vadd.f32 1.0, %v2049_v54 }
 0x93d   : > { %v1406_v49 = vmul.f32 0.5, %v1404_v58  ;;  %v1407_v59 = vmul.f32 %v1405_v55, %v1385_v57 }
 0x93f   : > { %v1408_v2 = vmul.f32 %v1406_v49, %v1388_v39 }
 0x941   : > { %v1409_v60 = vpack.c.bf16 %v1408_v2, %v1407_v59 }
 0x943   : > { %1896 = vmatmul.mubr.bf16.vlgmr.msra.gmra.mrb[20].mxu0 %v1409_v60 }
 0xa16   : > { %v1512_v63 = vpop.f32.mrb[20].mxu0 }
 0xa17   : > { %v1513_v0 = vadd.f32 %v1512_v63, %v1429_v3  ;;  %v1897_v1 = vpop.f32.mrb[21].mxu0  ;;  %1526 = sbr.rel (%p1740_p1) target bundleno = 2590 (0xa1e), region = 60 }
 0xa18   : > { %v1515_v4 = vpop.f32.mrb[22].mxu0 }
 0xa19   : > { %v1519_v5 = vadd.f32 %v1513_v0, %v2463_v51  ;;  %v1516_v6 = vadd.f32 %v1515_v4, %v1429_v3  ;;  %v1898_v7 = vpop.f32.mrb[23].mxu0 }
 0xa1b   : > { %1521 = vst.msk [vmem:[#allocation2] sm:$0xff] %vm454_vm1, %v1519_v5  ;;  %v1520_v8 = vadd.f32 %v1516_v6, %v2466_v53  ;;  %1527 = vst.msk [vmem:[%s2318_s3] sm:$0xff] (!%p1740_p1), %vm454_vm1, %v1519_v5 }
 0xa1d   : > { %1522 = vst.msk [vmem:[#allocation2 + $0x8] sm:$0xff] %vm454_vm1, %v1520_v8  ;;  %1528 = vst.msk [vmem:[%s2318_s3 + $0x8] sm:$0xff] (!%p1740_p1), %vm454_vm1, %v1520_v8 }
 0xa1e PF: > { %s1751_s25 = sshll.u32 %s2132_s9, 8  ;;  %s1543_s15 = sshll.u32 %s2318_s3, 4  ;;  %s2522_s15 = int_to_ptr.vmem [resolvable:$true] %s1543_s15 }
 0xa1f   : > { %s2519_s14 = scalar_lea.hbm %s2586_s8, %s1751_s25  ;;  %s2614_s30 = sand.u32 1, %s2120_s28  }
 0xa20   : > { %s2526_s16 = scalar_lea.sflag [#allocation4], %s2614_s30  ;;  %s2050_s10 = scalar_lea.vmem %s2522_s15, 256 }
 0xa21   : > { %p2051_p2 = scmp.ne.s32.totalorder %s2522_s15, %s2050_s10  ;;  %s2153_s9 = smov [#allocation3]  }
 0xa22   : > { %s2054_s22 = sshll.u32 %s2153_s9, 4  ;;  %s2055_s22 = int_to_ptr.vmem [resolvable:$false] %s2054_s22 }
 0xa23   : > { %p2052_p4 = pnand %p2051_p2, %p2250_p3  ;;  %s2056_s29 = scalar_lea.vmem %s2055_s22, 512 }
 0xa24   : > { %p2057_p6 = scmp.lt.s32.totalorder %s2522_s15, %s2055_s22  ;;  %p2058_p7 = scmp.lt.s32.totalorder %s2056_s29, %s2050_s10 }
 0xa25   : > { %p2053_p5 = pneg %p2052_p4 }
 0xa26   : > { %p2059_p8 = por %p2058_p7, %p2057_p6 }
 0xa28   : > { %p2060_p10 = pnand %p2059_p8, %p2053_p5 }
 0xa2a   : > { %2063 = shalt.err (!%p2060_p10)
}
 0xa2b   : > { %s2064_s3 = scalar_lea.hbm %s2519_s14, 256  ;;  %s2068_s1 = scalar_lea.hbm %s2586_s8, 512 }
 0xa2c   : > { %p2065_p11 = scmp.ne.s32.totalorder %s2519_s14, %s2064_s3  ;;  %p2069_p0 = scmp.lt.u32.totalorder %s2519_s14, %s2586_s8 }
 0xa2d   : > { %p2070_p1 = scmp.lt.u32.totalorder %s2068_s1, %s2064_s3  ;;  %p2072_p4 = scmp.lt.u32.totalorder %s2064_s3, %s2519_s14 }
 0xa2e   : > { %p2066_p12 = pnand %p2065_p11, %p2250_p3 }
 0xa2f   : > { %p2071_p2 = por %p2070_p1, %p2069_p0 }
 0xa30   : > { %p2067_p13 = pneg %p2066_p12 }
 0xa31   : > { %p2073_p5 = por %p2072_p4, %p2071_p2 }
 0xa33   : > { %p2074_p6 = pnand %p2073_p5, %p2067_p13 }
 0xa35   : > { %2077 = shalt.err (!%p2074_p6)
}
 0xa36   : > { %s2154_s21 = smov 128   ;;  %s2155_s23 = smov 8  }
 0xa37   : > { %1899 = dma.vmem_to_hbm [thread:$0]  (%p2250_p3), %s2522_s15, 256, %s2519_s14, %s2526_s16, %s2154_s21, %s2154_s21, %s2155_s23  }
 0xa38 PF: > { %s2615_s19 = sld [smem:[#allocation10_spill]]  ;;  %s2616_s20 = sld [smem:[#allocation6_spill]] }
 0xa3e   : > { %p1905_p7 = scmp.ge.s32.totalorder %s2615_s19, 2  ;;  %s1558_s24 = sand.u32 1, %s2616_s20  }
 0xa3f   : > { %s1559_s25 = scalar_lea.sflag [#allocation4], %s1558_s24 }
 0xa40   : > { %p1902_p8 = pnand %p1905_p7, %p2260_p9 }
 0xa42   : > { %2111 = dma.done.wait (!%p1902_p8), %s1559_s25, 256  }
 0xa43   : > { %2113 = vsyncadd (!%p1902_p8), %s1559_s25, 4294967040  ;;  %s21_s12 = sadd.s32 1, %s2615_s19   ;;  %s2618_s13 = sld [smem:[#allocation7_spill]] }
 0xa44   : > { %p18_p10 = scmp.ge.s32.totalorder %s21_s12, 6   ;;  %s2619_s29 = sld [smem:[#allocation14_spill]] }
 0xa45   : > { %s2620_s30 = sld [smem:[#allocation8_spill]]  ;;  %s2621_s9 = sld [smem:[#allocation9_spill]] }
 0xa46   : > { %s2622_s10 = sld [smem:[#allocation11_spill]]  ;;  %s2623_s11 = sld [smem:[#allocation12_spill]] }
 0xa47   : > { %s2624_s27 = smov %s2120_s28  ;;  %20 = sbr.rel (!%p18_p10) target bundleno = 9 (0x9), region = 116 }
 0xa49   : > { %s2625_s28 = smov %s2618_s13 }
 0xa4e   :  { %1564 = vsyncpa [#allocation4], 1 }
 0xa4f   :  { %1566 = vsyncpa [#allocation4 + $0x1], 1 }

</bundles_post_ra>
